<compile_context>
chip_gen: v5e
topology: v5e:2x2
jax: 0.10.0
libtpu: 0.0.40
codegen_flags: <defaults>
</compile_context>

<pallas_src>
import functools

import jax
import jax.numpy as jnp
import numpy as np
from jax.experimental import pallas as pl
from jax.experimental.pallas import tpu as pltpu

D_IN = 768  # fixed by the module (GRUCell(768, d_model))


def mtgru_kernel(gi1_ref, gi2x_ref,
                 w_hh1_ref, w_ih2h_ref, w_hh2_ref,
                 b_hh1_ref, b_hh2_ref, alpha_ref,
                 out_ref, h1_ref, h2_ref, *, d, tt):
    # grid = (batch_blocks [parallel], time_blocks [arbitrary / sequential])
    @pl.when(pl.program_id(1) == 0)
    def _():
        h1_ref[...] = jnp.zeros_like(h1_ref)
        h2_ref[...] = jnp.zeros_like(h2_ref)

    # loop-invariant loads, hoisted out of the inner time loop
    w_hh1 = w_hh1_ref[...]
    w_ih2h = w_ih2h_ref[...]
    w_hh2 = w_hh2_ref[...]
    b_hh1 = b_hh1_ref[...]
    b_hh2 = b_hh2_ref[...]
    a1 = alpha_ref[0]       # 1/tau1
    om_a1 = alpha_ref[1]    # 1 - 1/tau1
    a2 = alpha_ref[2]       # 1/tau2
    om_a2 = alpha_ref[3]    # 1 - 1/tau2

    def step(i, carry):
        h1, h2 = carry

        # ---- cell 1 (input projection precomputed outside the kernel) ----
        gi1 = gi1_ref[i]                                          # (Bt, 3d)
        gh1 = jnp.dot(h1, w_hh1, preferred_element_type=jnp.float32) + b_hh1
        r1 = jax.nn.sigmoid(gi1[:, :d] + gh1[:, :d])
        z1 = jax.nn.sigmoid(gi1[:, d:2 * d] + gh1[:, d:2 * d])
        n1 = jnp.tanh(gi1[:, 2 * d:] + r1 * gh1[:, 2 * d:])
        h1c = (1.0 - z1) * n1 + z1 * h1
        h1 = om_a1 * h1 + a1 * h1c

        # ---- cell 2 on cat(x, h1): split matmuls, no concatenate ----
        gi2 = gi2x_ref[i] + jnp.dot(h1, w_ih2h,
                                    preferred_element_type=jnp.float32)
        gh2 = jnp.dot(h2, w_hh2, preferred_element_type=jnp.float32) + b_hh2
        r2 = jax.nn.sigmoid(gi2[:, :d] + gh2[:, :d])
        z2 = jax.nn.sigmoid(gi2[:, d:2 * d] + gh2[:, d:2 * d])
        n2 = jnp.tanh(gi2[:, 2 * d:] + r2 * gh2[:, 2 * d:])
        h2c = (1.0 - z2) * n2 + z2 * h2
        h2 = om_a2 * h2 + a2 * h2c

        # lane-aligned slice stores (d is a multiple of 128 in practice)
        out_ref[i, :, :d] = h1
        out_ref[i, :, d:] = h2
        return (h1, h2)

    h1, h2 = jax.lax.fori_loop(0, tt, step, (h1_ref[...], h2_ref[...]))
    h1_ref[...] = h1
    h2_ref[...] = h2


def mtgru_forward(encoder_outputs, params, *, time_block=32,
                  bf16_projection=False):
    """encoder_outputs: (B, T, 768) f32 -> (B, T, 2*d_model) f32."""
    d = params["d_model"]
    B, T, F = encoder_outputs.shape
    assert F == D_IN

    # --- batch blocking: pad to a sublane multiple; split large batches so the
    #     "parallel" grid axis can use both TensorCores on v7x.
    Bt = 64 if B > 64 else max(8, ((B + 7) // 8) * 8)
    Bp = ((B + Bt - 1) // Bt) * Bt
    nb = Bp // Bt

    # --- time blocking: Tt steps per grid iteration, h carried in registers.
    Tt = min(T, time_block)
    Tp = ((T + Tt - 1) // Tt) * Tt
    nt = Tp // Tt

    # time-major, batch/time padded
    x_tm = jnp.zeros((Tp, Bp, F), jnp.float32)
    x_tm = x_tm.at[:T, :B, :].set(
        jnp.transpose(encoder_outputs.astype(jnp.float32), (1, 0, 2)))

    w_ih1_t = params["w_ih1"].T                  # (768, 3d)
    w_hh1_t = params["w_hh1"].T                  # (d, 3d)
    w_ih2x_t = params["w_ih2"][:, :F].T          # (768, 3d)   x-part of cell 2
    w_ih2h_t = params["w_ih2"][:, F:].T          # (d, 3d)     h1-part of cell 2
    w_hh2_t = params["w_hh2"].T                  # (d, 3d)
    b_ih1 = params["b_ih1"].reshape(1, 3 * d)
    b_hh1 = params["b_hh1"].reshape(1, 3 * d)
    b_ih2 = params["b_ih2"].reshape(1, 3 * d)
    b_hh2 = params["b_hh2"].reshape(1, 3 * d)

    # --- hoisted input-to-hidden projections: one large MXU-saturating matmul
    #     each, instead of M=8 matmuls inside the sequential recurrence.
    x_flat = x_tm.reshape(Tp * Bp, F)
    if bf16_projection:   # optional: ~2x MXU rate on v6e/v7x, f32 accumulate
        xcast = x_flat.astype(jnp.bfloat16)
        gi1 = jnp.dot(xcast, w_ih1_t.astype(jnp.bfloat16),
                      preferred_element_type=jnp.float32) + b_ih1
        gi2x = jnp.dot(xcast, w_ih2x_t.astype(jnp.bfloat16),
                       preferred_element_type=jnp.float32) + b_ih2
    else:
        gi1 = jnp.dot(x_flat, w_ih1_t, preferred_element_type=jnp.float32) + b_ih1
        gi2x = jnp.dot(x_flat, w_ih2x_t, preferred_element_type=jnp.float32) + b_ih2
    gi1 = gi1.reshape(Tp, Bp, 3 * d)
    gi2x = gi2x.reshape(Tp, Bp, 3 * d)

    a1 = 1.0 / float(params["tau1"])
    a2 = 1.0 / float(params["tau2"])
    alphas = jnp.array([a1, 1.0 - a1, a2, 1.0 - a2], jnp.float32)

    gi_spec = pl.BlockSpec((Tt, Bt, 3 * d), lambda b, t: (t, b, 0))
    vmem_full = pl.BlockSpec(memory_space=pltpu.MemorySpace.VMEM)

    out_tm = pl.pallas_call(
        functools.partial(mtgru_kernel, d=d, tt=Tt),
        out_shape=jax.ShapeDtypeStruct((Tp, Bp, 2 * d), jnp.float32),
        grid_spec=pltpu.PrefetchScalarGridSpec(
            num_scalar_prefetch=0,
            grid=(nb, nt),
            in_specs=[
                gi_spec,                     # gi1  = x @ W_ih1.T + b_ih1
                gi_spec,                     # gi2x = x @ W_ih2x.T + b_ih2
                vmem_full,                   # w_hh1_t   (d, 3d)  single-buffered
                vmem_full,                   # w_ih2h_t  (d, 3d)
                vmem_full,                   # w_hh2_t   (d, 3d)
                vmem_full,                   # b_hh1     (1, 3d)
                vmem_full,                   # b_hh2     (1, 3d)
                pl.BlockSpec(memory_space=pltpu.MemorySpace.SMEM),   # alphas
            ],
            out_specs=pl.BlockSpec((Tt, Bt, 2 * d), lambda b, t: (t, b, 0)),
            scratch_shapes=[pltpu.VMEM((Bt, d), jnp.float32),
                            pltpu.VMEM((Bt, d), jnp.float32)],
        ),
        compiler_params=pltpu.CompilerParams(
            dimension_semantics=("parallel", "arbitrary")),
    )(gi1, gi2x, w_hh1_t, w_ih2h_t, w_hh2_t, b_hh1, b_hh2, alphas)

    out = jnp.transpose(out_tm[:T, :B, :], (1, 0, 2))   # (B, T, 2d)
    # TODO(synk): F.dropout(p=0.5, training=True) uses the torch RNG; it has no
    # reproducible Pallas equivalent, so the dropout mask is omitted (identity).
    return out


# ------------------------- pure-JAX reference --------------------------------
def _gru_cell_ref(x, h, w_ih, w_hh, b_ih, b_hh, d):
    gi = x @ w_ih.T + b_ih
    gh = h @ w_hh.T + b_hh
    r = jax.nn.sigmoid(gi[:, :d] + gh[:, :d])
    z = jax.nn.sigmoid(gi[:, d:2 * d] + gh[:, d:2 * d])
    n = jnp.tanh(gi[:, 2 * d:] + r * gh[:, 2 * d:])
    return (1.0 - z) * n + z * h


def mtgru_ref(x, p):
    d = p["d_model"]
    B, T, _ = x.shape
    h1 = jnp.zeros((B, d), jnp.float32)
    h2 = jnp.zeros((B, d), jnp.float32)
    a1 = 1.0 / p["tau1"]
    a2 = 1.0 / p["tau2"]
    outs = []
    for t in range(T):
        xt = x[:, t]
        h1c = _gru_cell_ref(xt, h1, p["w_ih1"], p["w_hh1"], p["b_ih1"], p["b_hh1"], d)
        h1 = (1.0 - a1) * h1 + a1 * h1c
        xc = jnp.concatenate([xt, h1], axis=-1)
        h2c = _gru_cell_ref(xc, h2, p["w_ih2"], p["w_hh2"], p["b_ih2"], p["b_hh2"], d)
        h2 = (1.0 - a2) * h2 + a2 * h2c
        outs.append(jnp.concatenate([h1, h2], axis=-1))
    return jnp.stack(outs, axis=1)


# ------------------------- deterministic params ------------------------------
def init_params(key, d_model):
    k = 1.0 / np.sqrt(d_model)          # PyTorch GRUCell init range
    keys = jax.random.split(key, 8)
    u = lambda kk, shape: jax.random.uniform(kk, shape, jnp.float32, -k, k)
    return {
        "d_model": d_model,
        "tau1": 1.0,
        "tau2": 1.2,
        "w_ih1": u(keys[0], (3 * d_model, D_IN)),
        "w_hh1": u(keys[1], (3 * d_model, d_model)),
        "b_ih1": u(keys[2], (3 * d_model,)),
        "b_hh1": u(keys[3], (3 * d_model,)),
        "w_ih2": u(keys[4], (3 * d_model, D_IN + d_model)),
        "w_hh2": u(keys[5], (3 * d_model, d_model)),
        "b_ih2": u(keys[6], (3 * d_model,)),
        "b_hh2": u(keys[7], (3 * d_model,)),
    }


if __name__ == "__main__":
    d_model = 128
    key = jax.random.PRNGKey(0)
    pkey, xkey1, xkey2 = jax.random.split(key, 3)
    params = init_params(pkey, d_model)

    # case 1: nominal small shapes (B=2, T=8)
    x1 = jax.random.normal(xkey1, (2, 8, D_IN), jnp.float32)
    out1 = jax.block_until_ready(mtgru_forward(x1, params))
    assert out1.shape == (2, 8, 2 * d_model), out1.shape
    ref1 = jax.block_until_ready(mtgru_ref(x1, params))
    np.testing.assert_allclose(np.asarray(out1), np.asarray(ref1),
                               atol=2e-2, rtol=2e-2)

    # case 2: exercises multi-block time grid + time/batch padding
    x2 = jax.random.normal(xkey2, (3, 21, D_IN), jnp.float32)
    out2 = jax.block_until_ready(mtgru_forward(x2, params, time_block=8))
    ref2 = jax.block_until_ready(mtgru_ref(x2, params))
    np.testing.assert_allclose(np.asarray(out2), np.asarray(ref2),
                               atol=2e-2, rtol=2e-2)

    print("KERNEL_OK")
</pallas_src>

<mosaic_0001>
module attributes {stable_mosaic.version = 11 : i64} {
  func.func @mtgru_kernel(%arg0: i32, %arg1: i32, %arg2: memref<8x8x384xf32, #tpu.memory_space<vmem>>, %arg3: memref<8x8x384xf32, #tpu.memory_space<vmem>>, %arg4: memref<128x384xf32, #tpu.memory_space<vmem>>, %arg5: memref<128x384xf32, #tpu.memory_space<vmem>>, %arg6: memref<128x384xf32, #tpu.memory_space<vmem>>, %arg7: memref<1x384xf32, #tpu.memory_space<vmem>>, %arg8: memref<1x384xf32, #tpu.memory_space<vmem>>, %arg9: memref<4xf32, #tpu.memory_space<smem>>, %arg10: memref<8x8x256xf32, #tpu.memory_space<vmem>>, %arg11: memref<8x128xf32, #tpu.memory_space<vmem>>, %arg12: memref<8x128xf32, #tpu.memory_space<vmem>>) attributes {dimension_semantics = [#tpu.dimension_semantics<parallel>, #tpu.dimension_semantics<arbitrary>], iteration_bounds = array<i64: 1, 1>, scalar_prefetch = 0 : i64, scratch_operands = 2 : i64, tpu.core_type = #tpu.core_type<tc>, window_params = [{transform_indices = @transform_0, window_bounds = array<i64: 8, 8, 384>}, {transform_indices = @transform_1, window_bounds = array<i64: 8, 8, 384>}, {pipeline_mode = #tpu.pipeline_mode<synchronous>, transform_indices = @transform_2, window_bounds = array<i64: 128, 384>}, {pipeline_mode = #tpu.pipeline_mode<synchronous>, transform_indices = @transform_3, window_bounds = array<i64: 128, 384>}, {pipeline_mode = #tpu.pipeline_mode<synchronous>, transform_indices = @transform_4, window_bounds = array<i64: 128, 384>}, {pipeline_mode = #tpu.pipeline_mode<synchronous>, transform_indices = @transform_5, window_bounds = array<i64: 1, 384>}, {pipeline_mode = #tpu.pipeline_mode<synchronous>, transform_indices = @transform_6, window_bounds = array<i64: 1, 384>}, {transform_indices = @transform_7, window_bounds = array<i64: 4>}, {transform_indices = @transform_8, window_bounds = array<i64: 8, 8, 256>}]} {
    %c0_i32 = arith.constant 0 : i32
    %0 = arith.cmpi eq, %arg1, %c0_i32 : i32
    %1 = arith.extui %0 : i1 to i32
    %c0_i32_0 = arith.constant 0 : i32
    %2 = arith.cmpi ne, %1, %c0_i32_0 : i32
    scf.if %2 {
      %cst = arith.constant 0.000000e+00 : f32
      %18 = vector.broadcast %cst : f32 to vector<8x128xf32>
      %c0_21 = arith.constant 0 : index
      %c0_22 = arith.constant 0 : index
      %19 = vector.load %arg11[%c0_21, %c0_22] : memref<8x128xf32, #tpu.memory_space<vmem>>, vector<8x128xf32>
      tpu.vector_store %arg11[%c0_21, %c0_22], %18 {strides = array<i32>} : memref<8x128xf32, #tpu.memory_space<vmem>>, vector<8x128xf32>,
      %cst_23 = arith.constant 0.000000e+00 : f32
      %20 = vector.broadcast %cst_23 : f32 to vector<8x128xf32>
      %c0_24 = arith.constant 0 : index
      %c0_25 = arith.constant 0 : index
      %21 = vector.load %arg12[%c0_24, %c0_25] : memref<8x128xf32, #tpu.memory_space<vmem>>, vector<8x128xf32>
      tpu.vector_store %arg12[%c0_24, %c0_25], %20 {strides = array<i32>} : memref<8x128xf32, #tpu.memory_space<vmem>>, vector<8x128xf32>,
    } else {
    }
    %c0 = arith.constant 0 : index
    %c0_1 = arith.constant 0 : index
    %3 = vector.load %arg4[%c0, %c0_1] : memref<128x384xf32, #tpu.memory_space<vmem>>, vector<128x384xf32>
    %c0_2 = arith.constant 0 : index
    %c0_3 = arith.constant 0 : index
    %4 = vector.load %arg5[%c0_2, %c0_3] : memref<128x384xf32, #tpu.memory_space<vmem>>, vector<128x384xf32>
    %c0_4 = arith.constant 0 : index
    %c0_5 = arith.constant 0 : index
    %5 = vector.load %arg6[%c0_4, %c0_5] : memref<128x384xf32, #tpu.memory_space<vmem>>, vector<128x384xf32>
    %c0_6 = arith.constant 0 : index
    %c0_7 = arith.constant 0 : index
    %6 = vector.load %arg7[%c0_6, %c0_7] : memref<1x384xf32, #tpu.memory_space<vmem>>, vector<1x384xf32>
    %c0_8 = arith.constant 0 : index
    %c0_9 = arith.constant 0 : index
    %7 = vector.load %arg8[%c0_8, %c0_9] : memref<1x384xf32, #tpu.memory_space<vmem>>, vector<1x384xf32>
    %c0_10 = arith.constant 0 : index
    %8 = memref.load %arg9[%c0_10] : memref<4xf32, #tpu.memory_space<smem>>
    %c1 = arith.constant 1 : index
    %9 = memref.load %arg9[%c1] : memref<4xf32, #tpu.memory_space<smem>>
    %c2 = arith.constant 2 : index
    %10 = memref.load %arg9[%c2] : memref<4xf32, #tpu.memory_space<smem>>
    %c3 = arith.constant 3 : index
    %11 = memref.load %arg9[%c3] : memref<4xf32, #tpu.memory_space<smem>>
    %c0_11 = arith.constant 0 : index
    %c0_12 = arith.constant 0 : index
    %12 = vector.load %arg11[%c0_11, %c0_12] : memref<8x128xf32, #tpu.memory_space<vmem>>, vector<8x128xf32>
    %c0_13 = arith.constant 0 : index
    %c0_14 = arith.constant 0 : index
    %13 = vector.load %arg12[%c0_13, %c0_14] : memref<8x128xf32, #tpu.memory_space<vmem>>, vector<8x128xf32>
    %c0_i32_15 = arith.constant 0 : i32
    %c8_i32 = arith.constant 8 : i32
    %14 = arith.addi %c0_i32_15, %c8_i32 : i32
    %c1_i32 = arith.constant 1 : i32
    %15:2 = scf.for %arg13 = %c0_i32_15 to %14 step %c1_i32 iter_args(%arg14 = %12, %arg15 = %13) -> (vector<8x128xf32>, vector<8x128xf32>)  : i32 {
      %18 = arith.index_cast %arg13 : i32 to index
      %c0_21 = arith.constant 0 : index
      %c0_22 = arith.constant 0 : index
      %19 = vector.load %arg2[%18, %c0_21, %c0_22] : memref<8x8x384xf32, #tpu.memory_space<vmem>>, vector<1x8x384xf32>
      %20 = vector.shape_cast %19 : vector<1x8x384xf32> to vector<8x384xf32>
      %cst = arith.constant dense<0.000000e+00> : vector<8x384xf32>
      %21 = tpu.matmul %arg14, %3, %cst {dimension_numbers = #tpu.dot_dimension_numbers<[1], [0], [0], [1], [0, 0, 1, 1], [], []>} : vector<8x128xf32>, vector<128x384xf32>, vector<8x384xf32> -> vector<8x384xf32>
      %22 = vector.broadcast %6 : vector<1x384xf32> to vector<8x384xf32>
      %23 = arith.addf %21, %22 : vector<8x384xf32>
      %24 = vector.extract_strided_slice %20 {offsets = [0, 0], sizes = [8, 128], strides = [1, 1]} : vector<8x384xf32> to vector<8x128xf32>
      %25 = vector.extract_strided_slice %23 {offsets = [0, 0], sizes = [8, 128], strides = [1, 1]} : vector<8x384xf32> to vector<8x128xf32>
      %26 = arith.addf %24, %25 : vector<8x128xf32>
      %27 = arith.negf %26 : vector<8x128xf32>
      %28 = math.exp %27 : vector<8x128xf32>
      %cst_23 = arith.constant 1.000000e+00 : f32
      %29 = vector.broadcast %cst_23 : f32 to vector<8x128xf32>
      %30 = arith.addf %29, %28 : vector<8x128xf32>
      %31 = arith.divf %29, %30 : vector<8x128xf32>
      %32 = vector.extract_strided_slice %20 {offsets = [0, 128], sizes = [8, 128], strides = [1, 1]} : vector<8x384xf32> to vector<8x128xf32>
      %33 = vector.extract_strided_slice %23 {offsets = [0, 128], sizes = [8, 128], strides = [1, 1]} : vector<8x384xf32> to vector<8x128xf32>
      %34 = arith.addf %32, %33 : vector<8x128xf32>
      %35 = arith.negf %34 : vector<8x128xf32>
      %36 = math.exp %35 : vector<8x128xf32>
      %cst_24 = arith.constant 1.000000e+00 : f32
      %37 = vector.broadcast %cst_24 : f32 to vector<8x128xf32>
      %38 = arith.addf %37, %36 : vector<8x128xf32>
      %39 = arith.divf %37, %38 : vector<8x128xf32>
      %40 = vector.extract_strided_slice %20 {offsets = [0, 256], sizes = [8, 128], strides = [1, 1]} : vector<8x384xf32> to vector<8x128xf32>
      %41 = vector.extract_strided_slice %23 {offsets = [0, 256], sizes = [8, 128], strides = [1, 1]} : vector<8x384xf32> to vector<8x128xf32>
      %42 = arith.mulf %31, %41 : vector<8x128xf32>
      %43 = arith.addf %40, %42 : vector<8x128xf32>
      %44 = math.tanh %43 : vector<8x128xf32>
      %cst_25 = arith.constant 1.000000e+00 : f32
      %45 = vector.broadcast %cst_25 : f32 to vector<8x128xf32>
      %46 = arith.subf %45, %39 : vector<8x128xf32>
      %47 = arith.mulf %46, %44 : vector<8x128xf32>
      %48 = arith.mulf %39, %arg14 : vector<8x128xf32>
      %49 = arith.addf %47, %48 : vector<8x128xf32>
      %50 = vector.broadcast %9 : f32 to vector<8x128xf32>
      %51 = arith.mulf %50, %arg14 : vector<8x128xf32>
      %52 = vector.broadcast %8 : f32 to vector<8x128xf32>
      %53 = arith.mulf %52, %49 : vector<8x128xf32>
      %54 = arith.addf %51, %53 : vector<8x128xf32>
      %55 = arith.index_cast %arg13 : i32 to index
      %c0_26 = arith.constant 0 : index
      %c0_27 = arith.constant 0 : index
      %56 = vector.load %arg3[%55, %c0_26, %c0_27] : memref<8x8x384xf32, #tpu.memory_space<vmem>>, vector<1x8x384xf32>
      %57 = vector.shape_cast %56 : vector<1x8x384xf32> to vector<8x384xf32>
      %cst_28 = arith.constant dense<0.000000e+00> : vector<8x384xf32>
      %58 = tpu.matmul %54, %4, %cst_28 {dimension_numbers = #tpu.dot_dimension_numbers<[1], [0], [0], [1], [0, 0, 1, 1], [], []>} : vector<8x128xf32>, vector<128x384xf32>, vector<8x384xf32> -> vector<8x384xf32>
      %59 = arith.addf %57, %58 : vector<8x384xf32>
      %cst_29 = arith.constant dense<0.000000e+00> : vector<8x384xf32>
      %60 = tpu.matmul %arg15, %5, %cst_29 {dimension_numbers = #tpu.dot_dimension_numbers<[1], [0], [0], [1], [0, 0, 1, 1], [], []>} : vector<8x128xf32>, vector<128x384xf32>, vector<8x384xf32> -> vector<8x384xf32>
      %61 = vector.broadcast %7 : vector<1x384xf32> to vector<8x384xf32>
      %62 = arith.addf %60, %61 : vector<8x384xf32>
      %63 = vector.extract_strided_slice %59 {offsets = [0, 0], sizes = [8, 128], strides = [1, 1]} : vector<8x384xf32> to vector<8x128xf32>
      %64 = vector.extract_strided_slice %62 {offsets = [0, 0], sizes = [8, 128], strides = [1, 1]} : vector<8x384xf32> to vector<8x128xf32>
      %65 = arith.addf %63, %64 : vector<8x128xf32>
      %66 = arith.negf %65 : vector<8x128xf32>
      %67 = math.exp %66 : vector<8x128xf32>
      %cst_30 = arith.constant 1.000000e+00 : f32
      %68 = vector.broadcast %cst_30 : f32 to vector<8x128xf32>
      %69 = arith.addf %68, %67 : vector<8x128xf32>
      %70 = arith.divf %68, %69 : vector<8x128xf32>
      %71 = vector.extract_strided_slice %59 {offsets = [0, 128], sizes = [8, 128], strides = [1, 1]} : vector<8x384xf32> to vector<8x128xf32>
      %72 = vector.extract_strided_slice %62 {offsets = [0, 128], sizes = [8, 128], strides = [1, 1]} : vector<8x384xf32> to vector<8x128xf32>
      %73 = arith.addf %71, %72 : vector<8x128xf32>
      %74 = arith.negf %73 : vector<8x128xf32>
      %75 = math.exp %74 : vector<8x128xf32>
      %cst_31 = arith.constant 1.000000e+00 : f32
      %76 = vector.broadcast %cst_31 : f32 to vector<8x128xf32>
      %77 = arith.addf %76, %75 : vector<8x128xf32>
      %78 = arith.divf %76, %77 : vector<8x128xf32>
      %79 = vector.extract_strided_slice %59 {offsets = [0, 256], sizes = [8, 128], strides = [1, 1]} : vector<8x384xf32> to vector<8x128xf32>
      %80 = vector.extract_strided_slice %62 {offsets = [0, 256], sizes = [8, 128], strides = [1, 1]} : vector<8x384xf32> to vector<8x128xf32>
      %81 = arith.mulf %70, %80 : vector<8x128xf32>
      %82 = arith.addf %79, %81 : vector<8x128xf32>
      %83 = math.tanh %82 : vector<8x128xf32>
      %cst_32 = arith.constant 1.000000e+00 : f32
      %84 = vector.broadcast %cst_32 : f32 to vector<8x128xf32>
      %85 = arith.subf %84, %78 : vector<8x128xf32>
      %86 = arith.mulf %85, %83 : vector<8x128xf32>
      %87 = arith.mulf %78, %arg15 : vector<8x128xf32>
      %88 = arith.addf %86, %87 : vector<8x128xf32>
      %89 = vector.broadcast %11 : f32 to vector<8x128xf32>
      %90 = arith.mulf %89, %arg15 : vector<8x128xf32>
      %91 = vector.broadcast %10 : f32 to vector<8x128xf32>
      %92 = arith.mulf %91, %88 : vector<8x128xf32>
      %93 = arith.addf %90, %92 : vector<8x128xf32>
      %94 = arith.index_cast %arg13 : i32 to index
      %c0_33 = arith.constant 0 : index
      %c0_34 = arith.constant 0 : index
      %95 = vector.load %arg10[%94, %c0_33, %c0_34] : memref<8x8x256xf32, #tpu.memory_space<vmem>>, vector<1x8x128xf32>
      %96 = vector.shape_cast %95 : vector<1x8x128xf32> to vector<8x128xf32>
      %97 = vector.shape_cast %54 : vector<8x128xf32> to vector<1x8x128xf32>
      tpu.vector_store %arg10[%94, %c0_33, %c0_34], %97 {strides = array<i32>} : memref<8x8x256xf32, #tpu.memory_space<vmem>>, vector<1x8x128xf32>,
      %98 = arith.index_cast %arg13 : i32 to index
      %c0_35 = arith.constant 0 : index
      %c128 = arith.constant 128 : index
      %99 = vector.load %arg10[%98, %c0_35, %c128] : memref<8x8x256xf32, #tpu.memory_space<vmem>>, vector<1x8x128xf32>
      %100 = vector.shape_cast %99 : vector<1x8x128xf32> to vector<8x128xf32>
      %101 = vector.shape_cast %93 : vector<8x128xf32> to vector<1x8x128xf32>
      tpu.vector_store %arg10[%98, %c0_35, %c128], %101 {strides = array<i32>} : memref<8x8x256xf32, #tpu.memory_space<vmem>>, vector<1x8x128xf32>,
      scf.yield %54, %93 : vector<8x128xf32>, vector<8x128xf32>
    }
    %c8_i32_16 = arith.constant 8 : i32
    %c0_17 = arith.constant 0 : index
    %c0_18 = arith.constant 0 : index
    %16 = vector.load %arg11[%c0_17, %c0_18] : memref<8x128xf32, #tpu.memory_space<vmem>>, vector<8x128xf32>
    tpu.vector_store %arg11[%c0_17, %c0_18], %15#0 {strides = array<i32>} : memref<8x128xf32, #tpu.memory_space<vmem>>, vector<8x128xf32>,
    %c0_19 = arith.constant 0 : index
    %c0_20 = arith.constant 0 : index
    %17 = vector.load %arg12[%c0_19, %c0_20] : memref<8x128xf32, #tpu.memory_space<vmem>>, vector<8x128xf32>
    tpu.vector_store %arg12[%c0_19, %c0_20], %15#1 {strides = array<i32>} : memref<8x128xf32, #tpu.memory_space<vmem>>, vector<8x128xf32>,
    return
  }
  func.func @transform_0(%arg0: i32, %arg1: i32) -> (i32, i32, i32) {
    %c0_i32 = arith.constant 0 : i32
    %c0_i32_0 = arith.constant 0 : i32
    return %arg1, %arg0, %c0_i32 : i32, i32, i32
  }
  func.func @transform_1(%arg0: i32, %arg1: i32) -> (i32, i32, i32) {
    %c0_i32 = arith.constant 0 : i32
    %c0_i32_0 = arith.constant 0 : i32
    return %arg1, %arg0, %c0_i32 : i32, i32, i32
  }
  func.func @transform_2(%arg0: i32, %arg1: i32) -> (i32, i32) {
    %c0_i32 = arith.constant 0 : i32
    %c0_i32_0 = arith.constant 0 : i32
    %c0_i32_1 = arith.constant 0 : i32
    return %c0_i32, %c0_i32_0 : i32, i32
  }
  func.func @transform_3(%arg0: i32, %arg1: i32) -> (i32, i32) {
    %c0_i32 = arith.constant 0 : i32
    %c0_i32_0 = arith.constant 0 : i32
    %c0_i32_1 = arith.constant 0 : i32
    return %c0_i32, %c0_i32_0 : i32, i32
  }
  func.func @transform_4(%arg0: i32, %arg1: i32) -> (i32, i32) {
    %c0_i32 = arith.constant 0 : i32
    %c0_i32_0 = arith.constant 0 : i32
    %c0_i32_1 = arith.constant 0 : i32
    return %c0_i32, %c0_i32_0 : i32, i32
  }
  func.func @transform_5(%arg0: i32, %arg1: i32) -> (i32, i32) {
    %c0_i32 = arith.constant 0 : i32
    %c0_i32_0 = arith.constant 0 : i32
    %c0_i32_1 = arith.constant 0 : i32
    return %c0_i32, %c0_i32_0 : i32, i32
  }
  func.func @transform_6(%arg0: i32, %arg1: i32) -> (i32, i32) {
    %c0_i32 = arith.constant 0 : i32
    %c0_i32_0 = arith.constant 0 : i32
    %c0_i32_1 = arith.constant 0 : i32
    return %c0_i32, %c0_i32_0 : i32, i32
  }
  func.func @transform_7(%arg0: i32, %arg1: i32) -> i32 {
    %c0_i32 = arith.constant 0 : i32
    %c0_i32_0 = arith.constant 0 : i32
    return %c0_i32 : i32
  }
  func.func @transform_8(%arg0: i32, %arg1: i32) -> (i32, i32, i32) {
    %c0_i32 = arith.constant 0 : i32
    %c0_i32_0 = arith.constant 0 : i32
    return %arg1, %arg0, %c0_i32 : i32, i32, i32
  }
}

</mosaic_0001>

<bundles_post_ra>
// kernel: tpu_custom_call.1
= control target key start
LH: loop header
LB: loop body
LE: loop exit
PB: predicated region body
PF: predicated region fallthrough
CT: control target
= control target key end

     0   :  { %13 = vsyncpa [#allocation5], 0  ;;  %s1559_s0 = inlined_call_operand.hbm [shape: f32[8,8,384], index: 0, kind: input, shape index: {}]   ;;  %s1560_s1 = inlined_call_operand.hbm [shape: f32[8,8,384], index: 1, kind: input, shape index: {}]   ;;  %s1561_s2 = inlined_call_operand.hbm [shape: f32[128,384], index: 2, kind: input, shape index: {}]   ;;  %s1562_s3 = inlined_call_operand.hbm [shape: f32[128,384], index: 3, kind: input, shape index: {}]   ;;  %s1563_s4 = inlined_call_operand.hbm [shape: f32[128,384], index: 4, kind: input, shape index: {}]   ;;  %s1564_s5 = inlined_call_operand.vmem [shape: f32[1,384], index: 5, kind: input, shape index: {}]   ;;  %s1565_s6 = inlined_call_operand.hbm [shape: f32[1,384], index: 6, kind: input, shape index: {}]   ;;  %s1566_s7 = inlined_call_operand.vmem [shape: f32[4], index: 7, kind: input, shape index: {}]   ;;  %s1567_s8 = inlined_call_operand.hbm [shape: f32[8,8,256], index: 8, kind: output, shape index: {}]  }
   0x1   :  { %14 = vsyncpa [#allocation9], 0 }
   0x2   :  { %15 = vsyncpa [#allocation12], 0 }
   0x3   :  { %16 = vsyncpa [#allocation15], 0 }
   0x4   :  { %17 = vsyncpa [#allocation7], 0 }
   0x5   :  { %18 = vsyncpa [#allocation6], 0  ;;  %s36_s29 = sshll.u32 %s1560_s1, 4  ;;  %s947_s30 = smov [#allocation8]   ;;  %s37_s29 = int_to_ptr.hbm [resolvable:$true] %s36_s29 }
   0x6   :  { %s38_s9 = sshll.u32 %s947_s30, 4  ;;  %s62_s12 = sshll.u32 %s1562_s3, 4  ;;  %s39_s9 = int_to_ptr.vmem [resolvable:$true] %s38_s9  ;;  %s63_s12 = int_to_ptr.hbm [resolvable:$true] %s62_s12 }
   0x7   :  { %s948_s13 = smov 384   ;;  %s949_s14 = smov 24  }
   0x8   :  { %44 = dma.hbm_to_vmem [thread:$0]  %s37_s29, 3072, %s39_s9, [#allocation9], %s948_s13, %s948_s13, %s949_s14  }
   0x9   :  { %s950_s15 = smov [#allocation11]   ;;  %s23_s1 = sshll.u32 %s1559_s0, 4  ;;  %s24_s1 = int_to_ptr.hbm [resolvable:$true] %s23_s1 }
   0xa   :  { %s64_s16 = sshll.u32 %s950_s15, 4  ;;  %s49_s20 = sshll.u32 %s1561_s2, 4  ;;  %s65_s16 = int_to_ptr.vmem [resolvable:$true] %s64_s16  ;;  %s50_s20 = int_to_ptr.hbm [resolvable:$true] %s49_s20 }
   0xb   :  { %70 = dma.hbm_to_vmem [thread:$0]  %s63_s12, 6144, %s65_s16, [#allocation12], %s948_s13, %s948_s13, %s949_s14  }
   0xc   :  { %s951_s21 = smov [#allocation4]   ;;  %s952_s23 = smov [#allocation10]  }
   0xd   :  { %s25_s22 = sshll.u32 %s951_s21, 4  ;;  %s51_s0 = sshll.u32 %s952_s23, 4  ;;  %s26_s22 = int_to_ptr.vmem [resolvable:$true] %s25_s22  ;;  %s52_s0 = int_to_ptr.vmem [resolvable:$true] %s51_s0 }
   0xe   :  { %31 = dma.hbm_to_vmem [thread:$0]  %s24_s1, 3072, %s26_s22, [#allocation5], %s948_s13, %s948_s13, %s949_s14  }
   0xf   :  { %s75_s26 = sshll.u32 %s1563_s4, 4  ;;  %s91_s28 = sshll.u32 %s1565_s6, 4  ;;  %s76_s26 = int_to_ptr.hbm [resolvable:$true] %s75_s26  ;;  %s92_s28 = int_to_ptr.hbm [resolvable:$true] %s91_s28 }
  0x10   :  { %57 = dma.hbm_to_vmem [thread:$0]  %s50_s20, 6144, %s52_s0, [#allocation9], %s948_s13, %s948_s13, %s949_s14  }
  0x11   :  { %s953_s29 = smov [#allocation13]   ;;  %s954_s9 = smov [#allocation14]  }
  0x12   :  { %s77_s30 = sshll.u32 %s953_s29, 4  ;;  %s93_s4 = sshll.u32 %s954_s9, 4  ;;  %s78_s30 = int_to_ptr.vmem [resolvable:$true] %s77_s30  ;;  %s94_s4 = int_to_ptr.vmem [resolvable:$true] %s93_s4 }
  0x13   :  { %83 = dma.hbm_to_vmem [thread:$0]  %s76_s26, 6144, %s78_s30, [#allocation12], %s948_s13, %s948_s13, %s949_s14  }
  0x14   :  { %s102_s12 = sshll.u32 %s1566_s7, 4  ;;  %s955_s15 = smov [#allocation16]   ;;  %s103_s12 = int_to_ptr.vmem [resolvable:$true] %s102_s12 }
  0x15   :  { %96 = dma.hbm_to_vmem [thread:$0]  %s92_s28, 48, %s94_s4, [#allocation15]  }
  0x16   :  { %105 = dma.vmem_to_smem %s103_s12, 16, %s955_s15, [#allocation7]  }
  0x17   :  { %923 = dma.done.wait [#allocation5], 3072  }
  0x18   :  { %924 = vsyncadd [#allocation5], 4294964224 }
  0x19   :  { %925 = dma.done.wait [#allocation9], 9216  }
  0x1a   :  { %926 = vsyncadd [#allocation9], 4294958080 }
  0x1b   :  { %927 = dma.done.wait [#allocation12], 12288  }
  0x1c   :  { %928 = vsyncadd [#allocation12], 4294955008 }
  0x1d   :  { %929 = dma.done.wait [#allocation15], 48  }
  0x1e   :  { %930 = vsyncadd [#allocation15], 4294967248 }
  0x1f   :  { %931 = dma.done.wait [#allocation7], 16  }
  0x20   :  { %932 = vsyncadd [#allocation7], 4294967280 }
  0x21   :  { %134 = sfence }
  0x22   :  { %v1040_v0 = vld [vmem:[#allocation10] sm:$0xff]  ;;  %v1042_v1 = vld [vmem:[#allocation10 + $0x8] sm:$0xff]  ;;  %v1044_v2 = vld [vmem:[#allocation10 + $0x10] sm:$0xff]  ;;  %s1046_s6 = sld [smem:[#allocation16]]  ;;  %s1347_s18 = smov 0  }
  0x23   :  { %1570 = vst [vmem:[#allocation24_spill] sm:$0xff] %v1040_v0  ;;  %v1048_v3 = vld [vmem:[#allocation10 + $0x18] sm:$0xff]  ;;  %v1050_v4 = vld [vmem:[#allocation10 + $0x20] sm:$0xff]  ;;  %v1052_v5 = vld [vmem:[#allocation10 + $0x28] sm:$0xff]  ;;  %s1054_s7 = sld [smem:[#allocation16 + $0x1]] }
  0x24   :  { %1571 = vst [vmem:[#allocation25_spill] sm:$0xff] %v1042_v1  ;;  %v1056_v6 = vld [vmem:[#allocation10 + $0x30] sm:$0xff]  ;;  %v1058_v7 = vld [vmem:[#allocation10 + $0x38] sm:$0xff]  ;;  %v1060_v8 = vld [vmem:[#allocation10 + $0x40] sm:$0xff]  ;;  %s1062_s13 = sld [smem:[#allocation16 + $0x2]] }
  0x25   :  { %1572 = vst [vmem:[#allocation26_spill] sm:$0xff] %v1044_v2  ;;  %v1064_v9 = vld [vmem:[#allocation10 + $0x48] sm:$0xff]  ;;  %v1066_v10 = vld [vmem:[#allocation10 + $0x50] sm:$0xff]  ;;  %v1068_v11 = vld [vmem:[#allocation10 + $0x58] sm:$0xff]  ;;  %s1070_s14 = sld [smem:[#allocation16 + $0x3]] }
  0x26   :  { %1573 = vst [vmem:[#allocation27_spill] sm:$0xff] %v1048_v3  ;;  %v1072_v12 = vld [vmem:[#allocation10 + $0x60] sm:$0xff]  ;;  %v1074_v13 = vld [vmem:[#allocation10 + $0x68] sm:$0xff]  ;;  %v1076_v14 = vld [vmem:[#allocation10 + $0x70] sm:$0xff] }
  0x27   :  { %1574 = vst [vmem:[#allocation28_spill] sm:$0xff] %v1050_v4  ;;  %v1078_v15 = vld [vmem:[#allocation10 + $0x78] sm:$0xff]  ;;  %v1080_v16 = vld [vmem:[#allocation10 + $0x80] sm:$0xff]  ;;  %v1082_v17 = vld [vmem:[#allocation10 + $0x88] sm:$0xff] }
  0x28   :  { %1575 = vst [vmem:[#allocation29_spill] sm:$0xff] %v1052_v5  ;;  %v1084_v18 = vld [vmem:[#allocation10 + $0x90] sm:$0xff]  ;;  %v1086_v19 = vld [vmem:[#allocation10 + $0x98] sm:$0xff]  ;;  %v1088_v20 = vld [vmem:[#allocation10 + $0xa0] sm:$0xff] }
  0x29   :  { %1576 = vst [vmem:[#allocation30_spill] sm:$0xff] %v1056_v6  ;;  %v1090_v21 = vld [vmem:[#allocation10 + $0xa8] sm:$0xff]  ;;  %v1092_v22 = vld [vmem:[#allocation10 + $0xb0] sm:$0xff]  ;;  %v1094_v23 = vld [vmem:[#allocation10 + $0xb8] sm:$0xff] }
  0x2a   :  { %1577 = vst [vmem:[#allocation31_spill] sm:$0xff] %v1058_v7  ;;  %v1096_v24 = vld [vmem:[#allocation10 + $0xc0] sm:$0xff]  ;;  %v1098_v25 = vld [vmem:[#allocation10 + $0xc8] sm:$0xff]  ;;  %v1100_v26 = vld [vmem:[#allocation10 + $0xd0] sm:$0xff] }
  0x2b   :  { %1578 = vst [vmem:[#allocation32_spill] sm:$0xff] %v1060_v8  ;;  %v1102_v27 = vld [vmem:[#allocation10 + $0xd8] sm:$0xff]  ;;  %v1104_v28 = vld [vmem:[#allocation10 + $0xe0] sm:$0xff]  ;;  %v1106_v29 = vld [vmem:[#allocation10 + $0xe8] sm:$0xff] }
  0x2c   :  { %1579 = vst [vmem:[#allocation33_spill] sm:$0xff] %v1064_v9  ;;  %v1108_v30 = vld [vmem:[#allocation10 + $0xf0] sm:$0xff]  ;;  %v1110_v31 = vld [vmem:[#allocation10 + $0xf8] sm:$0xff]  ;;  %v1112_v32 = vld [vmem:[#allocation10 + $0x100] sm:$0xff] }
  0x2d   :  { %1580 = vst [vmem:[#allocation34_spill] sm:$0xff] %v1066_v10  ;;  %v1114_v33 = vld [vmem:[#allocation10 + $0x108] sm:$0xff]  ;;  %v1116_v34 = vld [vmem:[#allocation10 + $0x110] sm:$0xff]  ;;  %v1118_v35 = vld [vmem:[#allocation10 + $0x118] sm:$0xff] }
  0x2e   :  { %1581 = vst [vmem:[#allocation35_spill] sm:$0xff] %v1068_v11  ;;  %v1120_v36 = vld [vmem:[#allocation10 + $0x120] sm:$0xff]  ;;  %v1122_v37 = vld [vmem:[#allocation10 + $0x128] sm:$0xff]  ;;  %v1124_v38 = vld [vmem:[#allocation10 + $0x130] sm:$0xff] }
  0x2f   :  { %1582 = vst [vmem:[#allocation36_spill] sm:$0xff] %v1072_v12  ;;  %v1126_v39 = vld [vmem:[#allocation10 + $0x138] sm:$0xff]  ;;  %v1128_v40 = vld [vmem:[#allocation10 + $0x140] sm:$0xff]  ;;  %v1130_v41 = vld [vmem:[#allocation10 + $0x148] sm:$0xff] }
  0x30   :  { %1583 = vst [vmem:[#allocation37_spill] sm:$0xff] %v1074_v13  ;;  %v1132_v42 = vld [vmem:[#allocation10 + $0x150] sm:$0xff]  ;;  %v1134_v43 = vld [vmem:[#allocation10 + $0x158] sm:$0xff]  ;;  %v1136_v44 = vld [vmem:[#allocation10 + $0x160] sm:$0xff] }
  0x31   :  { %1584 = vst [vmem:[#allocation38_spill] sm:$0xff] %v1076_v14  ;;  %v1138_v45 = vld [vmem:[#allocation10 + $0x168] sm:$0xff]  ;;  %v1140_v46 = vld [vmem:[#allocation10 + $0x170] sm:$0xff]  ;;  %v1142_v47 = vld [vmem:[#allocation10 + $0x178] sm:$0xff] }
  0x32   :  { %1585 = vst [vmem:[#allocation39_spill] sm:$0xff] %v1078_v15  ;;  %v1144_v48 = vld [vmem:[#allocation11] sm:$0xff]  ;;  %v1146_v49 = vld [vmem:[#allocation11 + $0x8] sm:$0xff]  ;;  %v1148_v50 = vld [vmem:[#allocation11 + $0x10] sm:$0xff] }
  0x33   :  { %1586 = vst [vmem:[#allocation40_spill] sm:$0xff] %v1080_v16  ;;  %v1150_v51 = vld [vmem:[#allocation11 + $0x18] sm:$0xff]  ;;  %v1152_v52 = vld [vmem:[#allocation11 + $0x20] sm:$0xff]  ;;  %v1154_v53 = vld [vmem:[#allocation11 + $0x28] sm:$0xff] }
  0x34   :  { %1587 = vst [vmem:[#allocation41_spill] sm:$0xff] %v1082_v17  ;;  %v1156_v54 = vld [vmem:[#allocation11 + $0x30] sm:$0xff]  ;;  %v1158_v55 = vld [vmem:[#allocation11 + $0x38] sm:$0xff]  ;;  %v1160_v56 = vld [vmem:[#allocation11 + $0x40] sm:$0xff] }
  0x35   :  { %1588 = vst [vmem:[#allocation42_spill] sm:$0xff] %v1084_v18  ;;  %v1162_v57 = vld [vmem:[#allocation11 + $0x48] sm:$0xff]  ;;  %v1164_v58 = vld [vmem:[#allocation11 + $0x50] sm:$0xff]  ;;  %v1166_v59 = vld [vmem:[#allocation11 + $0x58] sm:$0xff] }
  0x36   :  { %1589 = vst [vmem:[#allocation43_spill] sm:$0xff] %v1086_v19  ;;  %v1168_v60 = vld [vmem:[#allocation11 + $0x60] sm:$0xff]  ;;  %v1170_v61 = vld [vmem:[#allocation11 + $0x68] sm:$0xff]  ;;  %v1172_v62 = vld [vmem:[#allocation11 + $0x70] sm:$0xff] }
  0x37   :  { %1590 = vst [vmem:[#allocation44_spill] sm:$0xff] %v1088_v20  ;;  %v1174_v63 = vld [vmem:[#allocation11 + $0x78] sm:$0xff]  ;;  %v1202_v2 = vld [vmem:[#allocation11 + $0xe8] sm:$0xff]  ;;  %v1208_v1 = vld [vmem:[#allocation11 + $0x100] sm:$0xff] }
  0x38   :  { %1591 = vst [vmem:[#allocation45_spill] sm:$0xff] %v1090_v21  ;;  %v1214_v0 = vld [vmem:[#allocation11 + $0x118] sm:$0xff]  ;;  %v1226_v5 = vld [vmem:[#allocation11 + $0x148] sm:$0xff]  ;;  %v1232_v4 = vld [vmem:[#allocation11 + $0x160] sm:$0xff] }
  0x39   :  { %1592 = vst [vmem:[#allocation46_spill] sm:$0xff] %v1092_v22  ;;  %v1238_v3 = vld [vmem:[#allocation11 + $0x178] sm:$0xff]  ;;  %v1250_v8 = vld [vmem:[#allocation13 + $0x28] sm:$0xff]  ;;  %v1256_v7 = vld [vmem:[#allocation13 + $0x40] sm:$0xff] }
  0x3a   :  { %1593 = vst [vmem:[#allocation47_spill] sm:$0xff] %v1094_v23 }
  0x3b   :  { %1594 = vst [vmem:[#allocation48_spill] sm:$0xff] %v1144_v48  ;;  %v1196_v48 = vld [vmem:[#allocation11 + $0xd0] sm:$0xff] }
  0x3c   :  { %1595 = vst [vmem:[#allocation49_spill] sm:$0xff] %v1146_v49  ;;  %v1178_v49 = vld [vmem:[#allocation11 + $0x88] sm:$0xff] }
  0x3d   :  { %1596 = vst [vmem:[#allocation50_spill] sm:$0xff] %v1148_v50  ;;  %v1176_v50 = vld [vmem:[#allocation11 + $0x80] sm:$0xff] }
  0x3e   :  { %1597 = vst [vmem:[#allocation51_spill] sm:$0xff] %v1150_v51  ;;  %v1220_v51 = vld [vmem:[#allocation11 + $0x130] sm:$0xff] }
  0x3f   :  { %1598 = vst [vmem:[#allocation52_spill] sm:$0xff] %v1152_v52  ;;  %v1182_v52 = vld [vmem:[#allocation11 + $0x98] sm:$0xff] }
  0x40   :  { %1599 = vst [vmem:[#allocation53_spill] sm:$0xff] %v1154_v53  ;;  %v1180_v53 = vld [vmem:[#allocation11 + $0x90] sm:$0xff] }
  0x41   :  { %1600 = vst [vmem:[#allocation54_spill] sm:$0xff] %v1156_v54  ;;  %v1244_v54 = vld [vmem:[#allocation13 + $0x10] sm:$0xff] }
  0x42   :  { %1601 = vst [vmem:[#allocation55_spill] sm:$0xff] %v1158_v55  ;;  %v1186_v55 = vld [vmem:[#allocation11 + $0xa8] sm:$0xff] }
  0x43   :  { %1602 = vst [vmem:[#allocation56_spill] sm:$0xff] %v1160_v56  ;;  %v1184_v56 = vld [vmem:[#allocation11 + $0xa0] sm:$0xff] }
  0x44   :  { %1603 = vst [vmem:[#allocation57_spill] sm:$0xff] %v1164_v58  ;;  %v1190_v58 = vld [vmem:[#allocation11 + $0xb8] sm:$0xff] }
  0x45   :  { %1604 = vst [vmem:[#allocation58_spill] sm:$0xff] %v1166_v59  ;;  %v1188_v59 = vld [vmem:[#allocation11 + $0xb0] sm:$0xff] }
  0x46   :  { %1605 = vst [vmem:[#allocation59_spill] sm:$0xff] %v1170_v61  ;;  %v1192_v61 = vld [vmem:[#allocation11 + $0xc0] sm:$0xff] }
  0x47   :  { %1606 = vst [vmem:[#allocation60_spill] sm:$0xff] %v1172_v62  ;;  %v1194_v62 = vld [vmem:[#allocation11 + $0xc8] sm:$0xff] }
  0x48   :  { %1607 = vst [vmem:[#allocation61_spill] sm:$0xff] %v1176_v50  ;;  %v1198_v50 = vld [vmem:[#allocation11 + $0xd8] sm:$0xff] }
  0x49   :  { %1608 = vst [vmem:[#allocation62_spill] sm:$0xff] %v1178_v49  ;;  %v1200_v49 = vld [vmem:[#allocation11 + $0xe0] sm:$0xff] }
  0x4a   :  { %1609 = vst [vmem:[#allocation63_spill] sm:$0xff] %v1182_v52  ;;  %v1204_v52 = vld [vmem:[#allocation11 + $0xf0] sm:$0xff] }
  0x4b   :  { %1610 = vst [vmem:[#allocation64_spill] sm:$0xff] %v1184_v56  ;;  %v1206_v56 = vld [vmem:[#allocation11 + $0xf8] sm:$0xff] }
  0x4c   :  { %1611 = vst [vmem:[#allocation65_spill] sm:$0xff] %v1188_v59  ;;  %v1210_v59 = vld [vmem:[#allocation11 + $0x108] sm:$0xff] }
  0x4d   :  { %1612 = vst [vmem:[#allocation66_spill] sm:$0xff] %v1190_v58  ;;  %v1212_v58 = vld [vmem:[#allocation11 + $0x110] sm:$0xff] }
  0x4e   :  { %1613 = vst [vmem:[#allocation67_spill] sm:$0xff] %v1194_v62  ;;  %v1216_v62 = vld [vmem:[#allocation11 + $0x120] sm:$0xff] }
  0x4f   :  { %1614 = vst [vmem:[#allocation68_spill] sm:$0xff] %v1196_v48  ;;  %v1218_v48 = vld [vmem:[#allocation11 + $0x128] sm:$0xff] }
  0x50   :  { %1615 = vst [vmem:[#allocation69_spill] sm:$0xff] %v1200_v49  ;;  %v1222_v49 = vld [vmem:[#allocation11 + $0x138] sm:$0xff] }
  0x51   :  { %1616 = vst [vmem:[#allocation70_spill] sm:$0xff] %v1202_v2  ;;  %v1224_v2 = vld [vmem:[#allocation11 + $0x140] sm:$0xff] }
  0x52   :  { %1617 = vst [vmem:[#allocation71_spill] sm:$0xff] %v1206_v56  ;;  %v1228_v56 = vld [vmem:[#allocation11 + $0x150] sm:$0xff] }
  0x53   :  { %1618 = vst [vmem:[#allocation72_spill] sm:$0xff] %v1208_v1  ;;  %v1230_v1 = vld [vmem:[#allocation11 + $0x158] sm:$0xff] }
  0x54   :  { %1619 = vst [vmem:[#allocation73_spill] sm:$0xff] %v1212_v58  ;;  %v1234_v58 = vld [vmem:[#allocation11 + $0x168] sm:$0xff] }
  0x55   :  { %1620 = vst [vmem:[#allocation74_spill] sm:$0xff] %v1214_v0  ;;  %v1236_v0 = vld [vmem:[#allocation11 + $0x170] sm:$0xff] }
  0x56   :  { %1621 = vst [vmem:[#allocation75_spill] sm:$0xff] %v1218_v48  ;;  %v1240_v48 = vld [vmem:[#allocation13] sm:$0xff] }
  0x57   :  { %1622 = vst [vmem:[#allocation76_spill] sm:$0xff] %v1220_v51  ;;  %v1242_v51 = vld [vmem:[#allocation13 + $0x8] sm:$0xff] }
  0x58   :  { %1623 = vst [vmem:[#allocation77_spill] sm:$0xff] %v1224_v2  ;;  %v1246_v2 = vld [vmem:[#allocation13 + $0x18] sm:$0xff] }
  0x59   :  { %1624 = vst [vmem:[#allocation78_spill] sm:$0xff] %v1226_v5  ;;  %v1248_v5 = vld [vmem:[#allocation13 + $0x20] sm:$0xff] }
  0x5a   :  { %1625 = vst [vmem:[#allocation79_spill] sm:$0xff] %v1230_v1  ;;  %v1252_v1 = vld [vmem:[#allocation13 + $0x30] sm:$0xff] }
  0x5b   :  { %1626 = vst [vmem:[#allocation80_spill] sm:$0xff] %v1232_v4  ;;  %v1254_v4 = vld [vmem:[#allocation13 + $0x38] sm:$0xff] }
  0x5c   :  { %1627 = vst [vmem:[#allocation81_spill] sm:$0xff] %v1236_v0  ;;  %v1258_v0 = vld [vmem:[#allocation13 + $0x48] sm:$0xff] }
  0x5d   :  { %1628 = vst [vmem:[#allocation82_spill] sm:$0xff] %v1238_v3  ;;  %v1260_v3 = vld [vmem:[#allocation13 + $0x50] sm:$0xff] }
  0x5e   :  { %1629 = vst [vmem:[#allocation83_spill] sm:$0xff] %v1240_v48  ;;  %v1262_v48 = vld [vmem:[#allocation13 + $0x58] sm:$0xff] }
  0x5f   :  { %1630 = vst [vmem:[#allocation84_spill] sm:$0xff] %v1242_v51  ;;  %v1264_v51 = vld [vmem:[#allocation13 + $0x60] sm:$0xff] }
  0x60   :  { %1631 = vst [vmem:[#allocation85_spill] sm:$0xff] %v1244_v54  ;;  %v1266_v54 = vld [vmem:[#allocation13 + $0x68] sm:$0xff] }
  0x61   :  { %1632 = vst [vmem:[#allocation86_spill] sm:$0xff] %v1246_v2  ;;  %v1268_v2 = vld [vmem:[#allocation13 + $0x70] sm:$0xff] }
  0x62   :  { %1633 = vst [vmem:[#allocation87_spill] sm:$0xff] %v1248_v5  ;;  %v1270_v5 = vld [vmem:[#allocation13 + $0x78] sm:$0xff] }
  0x63   :  { %1634 = vst [vmem:[#allocation88_spill] sm:$0xff] %v1250_v8  ;;  %v1272_v8 = vld [vmem:[#allocation13 + $0x80] sm:$0xff] }
  0x64   :  { %1635 = vst [vmem:[#allocation89_spill] sm:$0xff] %v1252_v1  ;;  %v1274_v1 = vld [vmem:[#allocation13 + $0x88] sm:$0xff] }
  0x65   :  { %1636 = vst [vmem:[#allocation90_spill] sm:$0xff] %v1254_v4  ;;  %v1276_v4 = vld [vmem:[#allocation13 + $0x90] sm:$0xff] }
  0x66   :  { %1637 = vst [vmem:[#allocation91_spill] sm:$0xff] %v1256_v7  ;;  %v1278_v7 = vld [vmem:[#allocation13 + $0x98] sm:$0xff] }
  0x67   :  { %1638 = vst [vmem:[#allocation92_spill] sm:$0xff] %v1258_v0  ;;  %v1280_v0 = vld [vmem:[#allocation13 + $0xa0] sm:$0xff] }
  0x68   :  { %1639 = vst [vmem:[#allocation93_spill] sm:$0xff] %v1260_v3  ;;  %v1282_v3 = vld [vmem:[#allocation13 + $0xa8] sm:$0xff] }
  0x69   :  { %1640 = vst [vmem:[#allocation94_spill] sm:$0xff] %v1262_v48  ;;  %v1284_v48 = vld [vmem:[#allocation13 + $0xb0] sm:$0xff] }
  0x6a   :  { %1641 = vst [vmem:[#allocation95_spill] sm:$0xff] %v1264_v51  ;;  %v1286_v51 = vld [vmem:[#allocation13 + $0xb8] sm:$0xff] }
  0x6b   :  { %1642 = vst [vmem:[#allocation96_spill] sm:$0xff] %v1266_v54  ;;  %v1288_v54 = vld [vmem:[#allocation13 + $0xc0] sm:$0xff] }
  0x6c   :  { %1643 = vst [vmem:[#allocation97_spill] sm:$0xff] %v1268_v2  ;;  %v1290_v2 = vld [vmem:[#allocation13 + $0xc8] sm:$0xff] }
  0x6d   :  { %1644 = vst [vmem:[#allocation98_spill] sm:$0xff] %v1270_v5  ;;  %v1292_v5 = vld [vmem:[#allocation13 + $0xd0] sm:$0xff] }
  0x6e   :  { %1645 = vst [vmem:[#allocation99_spill] sm:$0xff] %v1272_v8  ;;  %v1294_v8 = vld [vmem:[#allocation13 + $0xd8] sm:$0xff] }
  0x6f   :  { %1646 = vst [vmem:[#allocation100_spill] sm:$0xff] %v1274_v1  ;;  %v1296_v1 = vld [vmem:[#allocation13 + $0xe0] sm:$0xff] }
  0x70   :  { %1647 = vst [vmem:[#allocation101_spill] sm:$0xff] %v1276_v4  ;;  %v1298_v4 = vld [vmem:[#allocation13 + $0xe8] sm:$0xff] }
  0x71   :  { %1648 = vst [vmem:[#allocation102_spill] sm:$0xff] %v1278_v7  ;;  %v1300_v7 = vld [vmem:[#allocation13 + $0xf0] sm:$0xff] }
  0x72   :  { %1649 = vst [vmem:[#allocation103_spill] sm:$0xff] %v1280_v0  ;;  %v1302_v0 = vld [vmem:[#allocation13 + $0xf8] sm:$0xff] }
  0x73   :  { %1650 = vst [vmem:[#allocation104_spill] sm:$0xff] %v1282_v3  ;;  %v1304_v3 = vld [vmem:[#allocation13 + $0x100] sm:$0xff] }
  0x74   :  { %1651 = vst [vmem:[#allocation105_spill] sm:$0xff] %v1284_v48  ;;  %v1306_v48 = vld [vmem:[#allocation13 + $0x108] sm:$0xff] }
  0x75   :  { %1652 = vst [vmem:[#allocation106_spill] sm:$0xff] %v1286_v51  ;;  %v1308_v51 = vld [vmem:[#allocation13 + $0x110] sm:$0xff] }
  0x76   :  { %1653 = vst [vmem:[#allocation107_spill] sm:$0xff] %v1288_v54  ;;  %v1310_v54 = vld [vmem:[#allocation13 + $0x118] sm:$0xff] }
  0x77   :  { %1654 = vst [vmem:[#allocation108_spill] sm:$0xff] %v1290_v2  ;;  %v1312_v2 = vld [vmem:[#allocation13 + $0x120] sm:$0xff] }
  0x78   :  { %1655 = vst [vmem:[#allocation109_spill] sm:$0xff] %v1292_v5  ;;  %v1314_v5 = vld [vmem:[#allocation13 + $0x128] sm:$0xff] }
  0x79   :  { %1656 = vst [vmem:[#allocation110_spill] sm:$0xff] %v1294_v8  ;;  %v1316_v8 = vld [vmem:[#allocation13 + $0x130] sm:$0xff] }
  0x7a   :  { %1657 = vst [vmem:[#allocation111_spill] sm:$0xff] %v1296_v1  ;;  %v1318_v1 = vld [vmem:[#allocation13 + $0x138] sm:$0xff] }
  0x7b   :  { %1658 = vst [vmem:[#allocation112_spill] sm:$0xff] %v1298_v4  ;;  %v1320_v4 = vld [vmem:[#allocation13 + $0x140] sm:$0xff] }
  0x7c   :  { %1659 = vst [vmem:[#allocation113_spill] sm:$0xff] %v1300_v7  ;;  %v1322_v7 = vld [vmem:[#allocation13 + $0x148] sm:$0xff] }
  0x7d   :  { %1660 = vst [vmem:[#allocation114_spill] sm:$0xff] %v1302_v0  ;;  %v1324_v0 = vld [vmem:[#allocation13 + $0x150] sm:$0xff] }
  0x7e   :  { %1661 = vst [vmem:[#allocation115_spill] sm:$0xff] %v1304_v3  ;;  %v1326_v3 = vld [vmem:[#allocation13 + $0x158] sm:$0xff] }
  0x7f   :  { %1662 = vst [vmem:[#allocation116_spill] sm:$0xff] %v1306_v48  ;;  %v1328_v48 = vld [vmem:[#allocation13 + $0x160] sm:$0xff] }
  0x80   :  { %1663 = vst [vmem:[#allocation117_spill] sm:$0xff] %v1308_v51  ;;  %v1330_v51 = vld [vmem:[#allocation13 + $0x168] sm:$0xff] }
  0x81   :  { %1664 = vst [vmem:[#allocation118_spill] sm:$0xff] %v1310_v54  ;;  %v1332_v54 = vld [vmem:[#allocation13 + $0x170] sm:$0xff] }
  0x82   :  { %1665 = vst [vmem:[#allocation119_spill] sm:$0xff] %v1312_v2  ;;  %v1334_v2 = vld [vmem:[#allocation13 + $0x178] sm:$0xff] }
  0x83   :  { %1666 = vst [vmem:[#allocation120_spill] sm:$0xff] %v1314_v5  ;;  %v1341_v5 = vld [vmem:[#allocation14] sm:$0x7] }
  0x84   :  { %1667 = vst [vmem:[#allocation121_spill] sm:$0xff] %v1316_v8  ;;  %v1339_v8 = vld [vmem:[%s1564_s5] sm:$0x7] }
  0x85   :  { %1668 = vst [vmem:[#allocation122_spill] sm:$0xff] %v1318_v1 }
  0x86   :  { %1669 = vst [vmem:[#allocation123_spill] sm:$0xff] %v1320_v4  ;;  %v1345_v4 = vmov 0.0  }
  0x87   :  { %1670 = vst [vmem:[#allocation124_spill] sm:$0xff] %v1322_v7  ;;  %v1343_v7 = vmov 0.0  }
  0x88   :  { %1671 = vst [vmem:[#allocation125_spill] sm:$0xff] %v1324_v0 }
  0x89   :  { %1672 = vst [vmem:[#allocation126_spill] sm:$0xff] %v1326_v3 }
  0x8a   :  { %1673 = vst [vmem:[#allocation127_spill] sm:$0xff] %v1334_v2 }
  0x8b   :  { %1674 = vst [vmem:[#allocation128_spill] sm:$0xff] %v1339_v8 }
  0x8c   :  { %1675 = vst [vmem:[#allocation129_spill] sm:$0xff] %v1341_v5 }
  0x8d LB: > { %314 = vmatpush.msra.mxu0 %v1138_v45  ;;  %334 = vmatpush.msra.mxu1 %v1140_v46  ;;  %v1678_v21 = vld [vmem:[#allocation45_spill] sm:$0xff]  ;;  %v1679_v22 = vld [vmem:[#allocation46_spill] sm:$0xff]  ;;  %v1680_v23 = vld [vmem:[#allocation47_spill] sm:$0xff]  ;;  %s671_s5 = smul.u32 24, %s945_s18  ;;  %s673_s3 = sshll.u32 %s945_s18, 4  ;;  %v941_v4 = vphi %v1345_v4, %v1522_v4   ;;  %v937_v7 = vphi %v1343_v7, %v612_v7   ;;  %s945_s18 = sphi %s1347_s18, %s298_s18  }
  0x8e   : > { %354 = vmatpush.msra.mxu2 %v1142_v47  ;;  %431 = vmatpush.msra.mxu3 %v1234_v58  ;;  %v1681_v18 = vld [vmem:[#allocation42_spill] sm:$0xff]  ;;  %v1682_v19 = vld [vmem:[#allocation43_spill] sm:$0xff]  ;;  %v1683_v20 = vld [vmem:[#allocation44_spill] sm:$0xff]  ;;  %s1525_s19 = scalar_lea.vmem [#allocation17], %s673_s3  ;;  %s298_s18 = sadd.s32 1, %s945_s18  }
  0x8f   : > { %315 = vmatpush.msra.mxu0 %v1132_v42  ;;  %335 = vmatpush.msra.mxu1 %v1134_v43  ;;  %v1684_v15 = vld [vmem:[#allocation39_spill] sm:$0xff]  ;;  %v1685_v16 = vld [vmem:[#allocation40_spill] sm:$0xff]  ;;  %v1686_v17 = vld [vmem:[#allocation41_spill] sm:$0xff]  ;;  %s1510_s1 = scalar_lea.vmem [#allocation4], %s671_s5  ;;  %s1536_s20 = scalar_lea.vmem [#allocation8], %s671_s5 }
  0x90   : > { %355 = vmatpush.msra.mxu2 %v1136_v44  ;;  %432 = vmatpush.msra.mxu3 %v1228_v56  ;;  %v1687_v12 = vld [vmem:[#allocation36_spill] sm:$0xff]  ;;  %v1688_v13 = vld [vmem:[#allocation37_spill] sm:$0xff]  ;;  %v1689_v14 = vld [vmem:[#allocation38_spill] sm:$0xff]  ;;  %p295_p0 = scmp.ge.s32.totalorder %s298_s18, 8  }
  0x91   : > { %316 = vmatpush.msra.mxu0 %v1126_v39  ;;  %336 = vmatpush.msra.mxu1 %v1128_v40  ;;  %v1690_v9 = vld [vmem:[#allocation33_spill] sm:$0xff]  ;;  %v1691_v10 = vld [vmem:[#allocation34_spill] sm:$0xff]  ;;  %v1692_v11 = vld [vmem:[#allocation35_spill] sm:$0xff]  ;;  %s626_s23 = sshll.u32 (%p295_p0), %s1567_s8, 4  ;;  %s956_s0 = smov (%p295_p0), [#allocation17]   ;;  %s627_s23 = int_to_ptr.hbm [resolvable:$true] %s626_s23 }
  0x92   : > { %v1677_v8 = vld [vmem:[#allocation128_spill] sm:$0xff]  ;;  %356 = vmatpush.msra.mxu2 %v1130_v41  ;;  %433 = vmatpush.msra.mxu3 %v1222_v49  ;;  %v1693_v6 = vld [vmem:[#allocation30_spill] sm:$0xff]  ;;  %v1709_v0 = vld [vmem:[#allocation125_spill] sm:$0xff]  ;;  %s624_s24 = sshll.u32 (%p295_p0), %s956_s0, 4  ;;  %s957_s25 = smov (%p295_p0), 256   ;;  %s625_s24 = int_to_ptr.vmem [resolvable:$true] %s624_s24 }
  0x93   : > { %v1676_v5 = vld [vmem:[#allocation129_spill] sm:$0xff]  ;;  %317 = vmatpush.msra.mxu0 %v1120_v36  ;;  %337 = vmatpush.msra.mxu1 %v1122_v37  ;;  %v1712_v1 = vld [vmem:[#allocation122_spill] sm:$0xff]  ;;  %v1765_v2 = vld [vmem:[#allocation127_spill] sm:$0xff]  ;;  %s958_s26 = smov (%p295_p0), 16  }
  0x94   : > { %357 = vmatpush.msra.mxu2 %v1124_v38  ;;  %434 = vmatpush.msra.mxu3 %v1216_v62  ;;  %v1715_v3 = vld [vmem:[#allocation126_spill] sm:$0xff] }
  0x95   : > { %318 = vmatpush.msra.mxu0 %v1114_v33  ;;  %338 = vmatpush.msra.mxu1 %v1116_v34 }
  0x96   : > { %358 = vmatpush.msra.mxu2 %v1118_v35  ;;  %435 = vmatpush.msra.mxu3 %v1210_v59 }
  0x97   : > { %319 = vmatpush.msra.mxu0 %v1108_v30  ;;  %339 = vmatpush.msra.mxu1 %v1110_v31 }
  0x98   : > { %359 = vmatpush.msra.mxu2 %v1112_v32  ;;  %436 = vmatpush.msra.mxu3 %v1204_v52 }
  0x99   : > { %320 = vmatpush.msra.mxu0 %v1102_v27  ;;  %340 = vmatpush.msra.mxu1 %v1104_v28 }
  0x9a   : > { %360 = vmatpush.msra.mxu2 %v1106_v29  ;;  %437 = vmatpush.msra.mxu3 %v1198_v50 }
  0x9b   : > { %321 = vmatpush.msra.mxu0 %v1096_v24  ;;  %341 = vmatpush.msra.mxu1 %v1098_v25 }
  0x9c   : > { %361 = vmatpush.msra.mxu2 %v1100_v26  ;;  %438 = vmatpush.msra.mxu3 %v1192_v61 }
  0x9d   : > { %322 = vmatpush.msra.mxu0 %v1678_v21  ;;  %342 = vmatpush.msra.mxu1 %v1679_v22 }
  0x9e   : > { %362 = vmatpush.msra.mxu2 %v1680_v23  ;;  %439 = vmatpush.msra.mxu3 %v1186_v55 }
  0x9f   : > { %323 = vmatpush.msra.mxu0 %v1681_v18  ;;  %343 = vmatpush.msra.mxu1 %v1682_v19 }
  0xa0   : > { %363 = vmatpush.msra.mxu2 %v1683_v20  ;;  %440 = vmatpush.msra.mxu3 %v1180_v53 }
  0xa1   : > { %324 = vmatpush.msra.mxu0 %v1684_v15  ;;  %344 = vmatpush.msra.mxu1 %v1685_v16  ;;  %v1694_v15 = vld [vmem:[#allocation31_spill] sm:$0xff]  ;;  %v1695_v16 = vld [vmem:[#allocation32_spill] sm:$0xff] }
  0xa2   : > { %364 = vmatpush.msra.mxu2 %v1686_v17  ;;  %441 = vmatpush.msra.mxu3 %v1174_v63  ;;  %v1699_v17 = vld [vmem:[#allocation29_spill] sm:$0xff] }
  0xa3   : > { %325 = vmatpush.msra.mxu0 %v1687_v12  ;;  %345 = vmatpush.msra.mxu1 %v1688_v13  ;;  %v1696_v12 = vld [vmem:[#allocation54_spill] sm:$0xff]  ;;  %v1697_v13 = vld [vmem:[#allocation27_spill] sm:$0xff] }
  0xa4   : > { %365 = vmatpush.msra.mxu2 %v1689_v14  ;;  %442 = vmatpush.msra.mxu3 %v1168_v60  ;;  %v1698_v14 = vld [vmem:[#allocation28_spill] sm:$0xff] }
  0xa5   : > { %326 = vmatpush.msra.mxu0 %v1690_v9  ;;  %346 = vmatpush.msra.mxu1 %v1691_v10  ;;  %v1700_v9 = vld [vmem:[#allocation51_spill] sm:$0xff]  ;;  %v1701_v10 = vld [vmem:[#allocation24_spill] sm:$0xff] }
  0xa6   : > { %366 = vmatpush.msra.mxu2 %v1692_v11  ;;  %443 = vmatpush.msra.mxu3 %v1162_v57  ;;  %v1702_v11 = vld [vmem:[#allocation25_spill] sm:$0xff] }
  0xa7   : > { %327 = vmatpush.msra.mxu0 %v1693_v6  ;;  %347 = vmatpush.msra.mxu1 %v1694_v15  ;;  %v1703_v15 = vld [vmem:[#allocation26_spill] sm:$0xff] }
  0xa8   : > { %367 = vmatpush.msra.mxu2 %v1695_v16  ;;  %444 = vmatpush.msra.mxu3 %v1696_v12  ;;  %v1704_v16 = vld [vmem:[#allocation81_spill] sm:$0xff]  ;;  %v1705_v12 = vld [vmem:[#allocation82_spill] sm:$0xff] }
  0xa9   : > { %328 = vmatpush.msra.mxu0 %v1697_v13  ;;  %348 = vmatpush.msra.mxu1 %v1698_v14  ;;  %v1706_v13 = vld [vmem:[#allocation79_spill] sm:$0xff]  ;;  %v1711_v14 = vld [vmem:[#allocation78_spill] sm:$0xff] }
  0xaa   : > { %368 = vmatpush.msra.mxu2 %v1699_v17  ;;  %445 = vmatpush.msra.mxu3 %v1700_v9  ;;  %v1707_v9 = vld [vmem:[#allocation80_spill] sm:$0xff]  ;;  %v1713_v17 = vld [vmem:[#allocation75_spill] sm:$0xff] }
  0xab   : > { %329 = vmatpush.msra.mxu0 %v1701_v10  ;;  %349 = vmatpush.msra.mxu1 %v1702_v11  ;;  %v1708_v10 = vld [vmem:[#allocation48_spill] sm:$0xff]  ;;  %v1710_v11 = vld [vmem:[#allocation77_spill] sm:$0xff] }
  0xac   : > { %330 = vmatmul.f32.vlgmr.msra.gmra.mxu0 %v941_v4  ;;  %350 = vmatmul.f32.vlgmr.msra.gmra.mxu1 %v941_v4 }
  0xad   : > { %369 = vmatpush.msra.mxu2 %v1703_v15  ;;  %451 = vmatpush.msrb.mxu0 %v1704_v16  ;;  %v1714_v15 = vld [vmem:[#allocation76_spill] sm:$0xff]  ;;  %v1716_v16 = vld [vmem:[#allocation119_spill] sm:$0xff] }
  0xae   : > { %370 = vmatmul.f32.vlgmr.msra.gmra.mxu2 %v941_v4  ;;  %471 = vmatpush.msrb.mxu1 %v1705_v12  ;;  %v1717_v12 = vld [vmem:[#allocation73_spill] sm:$0xff] }
  0xaf   : > { %501 = vmatpush.msrb.mxu2 %v1330_v51  ;;  %452 = vmatpush.msrb.mxu0 %v1706_v13  ;;  %v1718_v13 = vld [vmem:[#allocation74_spill] sm:$0xff] }
  0xb0   : > { %472 = vmatpush.msrb.mxu1 %v1707_v9  ;;  %446 = vmatpush.msra.mxu3 %v1708_v10  ;;  %v1719_v9 = vld [vmem:[#allocation123_spill] sm:$0xff]  ;;  %v1720_v10 = vld [vmem:[#allocation116_spill] sm:$0xff] }
  0xb1   : > { %502 = vmatpush.msrb.mxu2 %v1709_v0  ;;  %453 = vmatpush.msrb.mxu0 %v1710_v11  ;;  %v1721_v11 = vld [vmem:[#allocation71_spill] sm:$0xff]  ;;  %v1723_v0 = vld [vmem:[#allocation120_spill] sm:$0xff] }
  0xb2   : > { %473 = vmatpush.msrb.mxu1 %v1711_v14  ;;  %521 = vmatpush.msrb.mxu3 %v1332_v54  ;;  %v1722_v14 = vld [vmem:[#allocation72_spill] sm:$0xff] }
  0xb3   : > { %503 = vmatpush.msrb.mxu2 %v1712_v1  ;;  %454 = vmatpush.msrb.mxu0 %v1713_v17  ;;  %v1724_v17 = vld [vmem:[#allocation113_spill] sm:$0xff]  ;;  %v1726_v1 = vld [vmem:[#allocation70_spill] sm:$0xff] }
  0xb4   : > { %474 = vmatpush.msrb.mxu1 %v1714_v15  ;;  %522 = vmatpush.msrb.mxu3 %v1715_v3  ;;  %v1725_v15 = vld [vmem:[#allocation69_spill] sm:$0xff] }
  0xb5   : > { %504 = vmatpush.msrb.mxu2 %v1716_v16  ;;  %455 = vmatpush.msrb.mxu0 %v1717_v12  ;;  %v1727_v16 = vld [vmem:[#allocation117_spill] sm:$0xff]  ;;  %v1728_v12 = vld [vmem:[#allocation110_spill] sm:$0xff] }
  0xb6   : > { %475 = vmatpush.msrb.mxu1 %v1718_v13  ;;  %523 = vmatpush.msrb.mxu3 %v1719_v9  ;;  %v1729_v13 = vld [vmem:[#allocation67_spill] sm:$0xff]  ;;  %v1730_v9 = vld [vmem:[#allocation68_spill] sm:$0xff] }
  0xb7   : > { %505 = vmatpush.msrb.mxu2 %v1720_v10  ;;  %456 = vmatpush.msrb.mxu0 %v1721_v11  ;;  %v1731_v10 = vld [vmem:[#allocation114_spill] sm:$0xff]  ;;  %v1732_v11 = vld [vmem:[#allocation107_spill] sm:$0xff] }
  0xb8   : > { %476 = vmatpush.msrb.mxu1 %v1722_v14  ;;  %524 = vmatpush.msrb.mxu3 %v1723_v0  ;;  %v1733_v14 = vld [vmem:[#allocation65_spill] sm:$0xff]  ;;  %v1734_v0 = vld [vmem:[#allocation66_spill] sm:$0xff] }
  0xb9   : > { %506 = vmatpush.msrb.mxu2 %v1724_v17  ;;  %457 = vmatpush.msrb.mxu0 %v1725_v15  ;;  %v1735_v17 = vld [vmem:[#allocation111_spill] sm:$0xff]  ;;  %v1736_v15 = vld [vmem:[#allocation104_spill] sm:$0xff] }
  0xba   : > { %477 = vmatpush.msrb.mxu1 %v1726_v1  ;;  %525 = vmatpush.msrb.mxu3 %v1727_v16  ;;  %v1737_v1 = vld [vmem:[#allocation63_spill] sm:$0xff]  ;;  %v1738_v16 = vld [vmem:[#allocation64_spill] sm:$0xff] }
  0xbb   : > { %507 = vmatpush.msrb.mxu2 %v1728_v12  ;;  %458 = vmatpush.msrb.mxu0 %v1729_v13  ;;  %v1739_v12 = vld [vmem:[#allocation108_spill] sm:$0xff]  ;;  %v1740_v13 = vld [vmem:[#allocation101_spill] sm:$0xff] }
  0xbc   : > { %478 = vmatpush.msrb.mxu1 %v1730_v9  ;;  %526 = vmatpush.msrb.mxu3 %v1731_v10  ;;  %v1741_v9 = vld [vmem:[#allocation61_spill] sm:$0xff]  ;;  %v1742_v10 = vld [vmem:[#allocation62_spill] sm:$0xff] }
  0xbd   : > { %508 = vmatpush.msrb.mxu2 %v1732_v11  ;;  %459 = vmatpush.msrb.mxu0 %v1733_v14  ;;  %v1743_v11 = vld [vmem:[#allocation105_spill] sm:$0xff]  ;;  %v1744_v14 = vld [vmem:[#allocation98_spill] sm:$0xff] }
  0xbe   : > { %479 = vmatpush.msrb.mxu1 %v1734_v0  ;;  %527 = vmatpush.msrb.mxu3 %v1735_v17  ;;  %v1745_v0 = vld [vmem:[#allocation59_spill] sm:$0xff]  ;;  %v1746_v17 = vld [vmem:[#allocation60_spill] sm:$0xff] }
  0xbf   : > { %509 = vmatpush.msrb.mxu2 %v1736_v15  ;;  %460 = vmatpush.msrb.mxu0 %v1737_v1  ;;  %v1747_v15 = vld [vmem:[#allocation102_spill] sm:$0xff]  ;;  %v1748_v1 = vld [vmem:[#allocation95_spill] sm:$0xff] }
  0xc0   : > { %480 = vmatpush.msrb.mxu1 %v1738_v16  ;;  %528 = vmatpush.msrb.mxu3 %v1739_v12  ;;  %v1749_v16 = vld [vmem:[#allocation57_spill] sm:$0xff]  ;;  %v1750_v12 = vld [vmem:[#allocation58_spill] sm:$0xff] }
  0xc1   : > { %510 = vmatpush.msrb.mxu2 %v1740_v13  ;;  %461 = vmatpush.msrb.mxu0 %v1741_v9  ;;  %v1751_v13 = vld [vmem:[#allocation99_spill] sm:$0xff]  ;;  %v1752_v9 = vld [vmem:[#allocation92_spill] sm:$0xff] }
  0xc2   : > { %481 = vmatpush.msrb.mxu1 %v1742_v10  ;;  %529 = vmatpush.msrb.mxu3 %v1743_v11  ;;  %v1753_v10 = vld [vmem:[#allocation55_spill] sm:$0xff]  ;;  %v1754_v11 = vld [vmem:[#allocation56_spill] sm:$0xff] }
  0xc3   : > { %511 = vmatpush.msrb.mxu2 %v1744_v14  ;;  %462 = vmatpush.msrb.mxu0 %v1745_v0  ;;  %v1755_v14 = vld [vmem:[#allocation96_spill] sm:$0xff]  ;;  %v1756_v0 = vld [vmem:[#allocation89_spill] sm:$0xff] }
  0xc4   : > { %482 = vmatpush.msrb.mxu1 %v1746_v17  ;;  %530 = vmatpush.msrb.mxu3 %v1747_v15  ;;  %v1757_v17 = vld [vmem:[#allocation52_spill] sm:$0xff]  ;;  %v1758_v15 = vld [vmem:[#allocation53_spill] sm:$0xff] }
  0xc5   : > { %512 = vmatpush.msrb.mxu2 %v1748_v1  ;;  %463 = vmatpush.msrb.mxu0 %v1749_v16  ;;  %v1759_v1 = vld [vmem:[#allocation93_spill] sm:$0xff]  ;;  %v1760_v16 = vld [vmem:[#allocation86_spill] sm:$0xff] }
  0xc6   : > { %483 = vmatpush.msrb.mxu1 %v1750_v12  ;;  %531 = vmatpush.msrb.mxu3 %v1751_v13  ;;  %v1761_v12 = vld [vmem:[#allocation49_spill] sm:$0xff]  ;;  %v1762_v13 = vld [vmem:[#allocation50_spill] sm:$0xff] }
  0xc7   : > { %513 = vmatpush.msrb.mxu2 %v1752_v9  ;;  %464 = vmatpush.msrb.mxu0 %v1753_v10  ;;  %v1763_v9 = vld [vmem:[#allocation90_spill] sm:$0xff]  ;;  %v1764_v10 = vld [vmem:[#allocation83_spill] sm:$0xff] }
  0xc8   : > { %484 = vmatpush.msrb.mxu1 %v1754_v11  ;;  %532 = vmatpush.msrb.mxu3 %v1755_v14  ;;  %v1766_v11 = vld [vmem:[#allocation87_spill] sm:$0xff]  ;;  %v1767_v14 = vld [vmem:[#allocation84_spill] sm:$0xff] }
  0xc9   : > { %514 = vmatpush.msrb.mxu2 %v1756_v0  ;;  %465 = vmatpush.msrb.mxu0 %v1757_v17  ;;  %v1768_v0 = vld [vmem:[#allocation124_spill] sm:$0xff]  ;;  %v1769_v17 = vld [vmem:[#allocation121_spill] sm:$0xff] }
  0xca   : > { %485 = vmatpush.msrb.mxu1 %v1758_v15  ;;  %533 = vmatpush.msrb.mxu3 %v1759_v1  ;;  %v1770_v15 = vld [vmem:[#allocation118_spill] sm:$0xff]  ;;  %v1771_v1 = vld [vmem:[#allocation115_spill] sm:$0xff] }
  0xcb   : > { %515 = vmatpush.msrb.mxu2 %v1760_v16  ;;  %466 = vmatpush.msrb.mxu0 %v1761_v12  ;;  %v1772_v16 = vld [vmem:[#allocation112_spill] sm:$0xff]  ;;  %v1773_v12 = vld [vmem:[#allocation109_spill] sm:$0xff] }
  0xcc   : > { %486 = vmatpush.msrb.mxu1 %v1762_v13  ;;  %534 = vmatpush.msrb.mxu3 %v1763_v9  ;;  %v1774_v13 = vld [vmem:[#allocation106_spill] sm:$0xff]  ;;  %v1775_v9 = vld [vmem:[#allocation103_spill] sm:$0xff] }
  0xcd   : > { %516 = vmatpush.msrb.mxu2 %v1764_v10  ;;  %541 = vmatpush.msra.mxu0 %v1765_v2  ;;  %v1776_v10 = vld [vmem:[#allocation100_spill] sm:$0xff] }
  0xce   : > { %535 = vmatpush.msrb.mxu3 %v1766_v11  ;;  %v1777_v11 = vld [vmem:[#allocation97_spill] sm:$0xff]  ;;  %517 = vmatmul.f32.vlgmr.msrb.gmra.mxu2 %v937_v7 }
  0xcf   : > { %542 = vmatpush.msra.mxu0 %v1328_v48 }
  0xd0   : > { %536 = vmatpush.msrb.mxu3 %v1767_v14  ;;  %v1778_v14 = vld [vmem:[#allocation94_spill] sm:$0xff] }
  0xd1   : > { %543 = vmatpush.msra.mxu0 %v1768_v0  ;;  %v1779_v0 = vld [vmem:[#allocation91_spill] sm:$0xff] }
  0xd3   : > { %544 = vmatpush.msra.mxu0 %v1769_v17  ;;  %v1780_v17 = vld [vmem:[#allocation88_spill] sm:$0xff] }
  0xd5   : > { %545 = vmatpush.msra.mxu0 %v1770_v15  ;;  %v1781_v15 = vld [vmem:[#allocation85_spill] sm:$0xff] }
  0xd7   : > { %546 = vmatpush.msra.mxu0 %v1771_v1  ;;  %v308_v1 = vperm.slane %v1677_v8, 0 }
  0xd9   : > { %547 = vmatpush.msra.mxu0 %v1772_v16  ;;  %v309_v16 = vperm.slane %v1677_v8, 1 }
  0xdb   : > { %548 = vmatpush.msra.mxu0 %v1773_v12  ;;  %v304_v12 = vld [vmem:[%s1510_s1] sm:$0xff] }
  0xdd   : > { %549 = vmatpush.msra.mxu0 %v1774_v13 }
  0xdf   : > { %550 = vmatpush.msra.mxu0 %v1775_v9  ;;  %v305_v9 = vld [vmem:[%s1510_s1 + $0x8] sm:$0xff] }
  0xe1   : > { %551 = vmatpush.msra.mxu0 %v1776_v10 }
  0xe3   : > { %552 = vmatpush.msra.mxu0 %v1777_v11 }
  0xe5   : > { %553 = vmatpush.msra.mxu0 %v1778_v14 }
  0xe7   : > { %554 = vmatpush.msra.mxu0 %v1779_v0 }
  0xe9   : > { %555 = vmatpush.msra.mxu0 %v1780_v17 }
  0xeb   : > { %556 = vmatpush.msra.mxu0 %v1781_v15 }
 0x129   : > { %v331_v13 = vpop.f32.mrf.mxu0  ;;  %v351_v10 = vpop.f32.mrf.mxu1 }
 0x12a   : > { %v332_v11 = vadd.f32 %v331_v13, %v308_v1  ;;  %v352_v14 = vadd.f32 %v351_v10, %v309_v16  ;;  %v310_v1 = vperm.slane %v1677_v8, 2 }
 0x12c   : > { %v374_v0 = vadd.f32 %v332_v11, %v304_v12  ;;  %v394_v17 = vadd.f32 %v352_v14, %v305_v9 }
 0x12e   : > { %v664_v2 = vmul.f32 -1.442695, %v374_v0  ;;  %v665_v15 = vmul.f32 -1.442695, %v394_v17  ;;  %v306_v17 = vld [vmem:[%s1510_s1 + $0x10] sm:$0xff] }
 0x130   : > { %711 = vpow2.f32 %v664_v2 }
 0x131   : > { %713 = vpow2.f32 %v665_v15  ;;  %v371_v13 = vpop.f32.mrf.mxu2 }
 0x136   : > { %v712_v3 = vpop.eup %711 }
 0x137   : > { %v714_v6 = vpop.eup %713  ;;  %v378_v18 = vadd.f32 1.0, %v712_v3 }
 0x138   : > { %v398_v19 = vadd.f32 1.0, %v714_v6  ;;  %v372_v6 = vadd.f32 %v371_v13, %v310_v1 }
 0x139   : > { %715 = vrcp.f32 %v378_v18  ;;  %v390_v2 = vand.u32 2147483648, %v378_v18  ;;  %v388_v10 = vand.u32 2147483647, %v378_v18  ;;  %vm384_vm1 = vweird.f32 %v378_v18 }
 0x13a   : > { %717 = vrcp.f32 %v398_v19  ;;  %vm404_vm4 = vweird.f32 %v398_v19  ;;  %v410_v15 = vand.u32 2147483648, %v398_v19  ;;  %v408_v8 = vand.u32 2147483647, %v398_v19 }
 0x13b   : > { %v391_v14 = vor.u32 1.1754944e-38, %v390_v2  ;;  %vm389_vm3 = vcmp.eq.f32.partialorder %v388_v10, 8.507059e+37 }
 0x13c   : > { %v411_v13 = vor.u32 1.1754944e-38, %v410_v15  ;;  %vm409_vm7 = vcmp.eq.f32.partialorder %v408_v8, 8.507059e+37  ;;  %v495_v8 = vperm.slane %v1676_v5, 0 }
 0x13f   : > { %v716_v20 = vpop.eup %715 }
 0x140   : > { %v718_v21 = vpop.eup %717  ;;  %v380_v22 = vmul.f32 %v716_v20, %v378_v18  ;;  %vm385_vm0 = vweird.f32 %v716_v20 }
 0x141   : > { %v400_v23 = vmul.f32 %v718_v21, %v398_v19  ;;  %vm386_vm2 = vmor %vm384_vm1, %vm385_vm0  ;;  %vm405_vm5 = vweird.f32 %v718_v21 }
 0x142   : > { %v381_v16 = vsub.f32 1.0, %v380_v22  ;;  %vm406_vm6 = vmor %vm404_vm4, %vm405_vm5 }
 0x143   : > { %v401_v12 = vsub.f32 1.0, %v400_v23 }
 0x144   : > { %v382_v9 = vmul.f32 %v716_v20, %v381_v16 }
 0x145   : > { %v402_v3 = vmul.f32 %v718_v21, %v401_v12 }
 0x146   : > { %v383_v11 = vadd.f32 %v716_v20, %v382_v9  ;;  %v421_v9 = vstv %s1054_s7 }
 0x147   : > { %v403_v23 = vadd.f32 %v718_v21, %v402_v3  ;;  %v423_v3 = vstv %s1046_s6 }
 0x148   : > { %v387_v0 = vsel %vm386_vm2, %v716_v20, %v383_v11 }
 0x149   : > { %v392_v22 = vsel %vm389_vm3, %v391_v14, %v387_v0  ;;  %v407_v1 = vsel %vm406_vm6, %v718_v21, %v403_v23  ;;  %v428_v0 = vld [vmem:[%s1536_s20] sm:$0xff] }
 0x14a   : > { %v414_v16 = vmul.f32 %v392_v22, %v372_v6  ;;  %v412_v18 = vsel %vm409_vm7, %v411_v13, %v407_v1  ;;  %v422_v6 = vmul.f32 %v941_v4, %v421_v9  ;;  %v429_v1 = vld [vmem:[%s1536_s20 + $0x8] sm:$0xff] }
 0x14b   : > { %v417_v20 = vsub.f32 1.0, %v412_v18  ;;  %v419_v11 = vmul.f32 %v941_v4, %v412_v18 }
 0x14c   : > { %v415_v12 = vadd.f32 %v414_v16, %v306_v17 }
 0x14e   : > { %719 = vtanh.f32 %v415_v12  ;;  %v496_v12 = vperm.slane %v1676_v5, 1 }
 0x151   : > { %v518_v21 = vpop.f32.mrf.mxu2 }
 0x152   : > { %v519_v17 = vadd.f32 %v518_v21, %v495_v8  ;;  %v497_v21 = vperm.slane %v1676_v5, 2 }
 0x154   : > { %v720_v2 = vpop.eup %719 }
 0x155   : > { %v418_v10 = vmul.f32 %v720_v2, %v417_v20 }
 0x157   : > { %v420_v14 = vadd.f32 %v419_v11, %v418_v10 }
 0x159   : > { %v424_v19 = vmul.f32 %v423_v3, %v420_v14 }
 0x15b   : > { %v1522_v4 = vadd.f32 %v424_v19, %v422_v6  }
 0x15d   : > { %447 = vmatmul.f32.vlgmr.msra.gmra.mxu3 %v1522_v4  ;;  %616 = vst [vmem:[%s1525_s19] sm:$0xff] %v1522_v4  ;;  %467 = vmatmul.f32.vlgmr.msrb.gmra.mxu0 %v1522_v4 }
 0x15e   : > { %487 = vmatmul.f32.vlgmr.msrb.gmra.mxu1 %v1522_v4 }
 0x165   : > { %537 = vmatmul.f32.vlgmr.msrb.gmra.mxu3 %v937_v7  ;;  %557 = vmatmul.f32.vlgmr.msra.gmra.mxu0 %v937_v7 }
 0x1da   : > { %v468_v13 = vpop.f32.mrf.mxu0 }
 0x1db   : > { %v492_v20 = vadd.f32 %v468_v13, %v429_v1  ;;  %v430_v13 = vld [vmem:[%s1536_s20 + $0x10] sm:$0xff] }
 0x1e0   : > { %v448_v22 = vpop.f32.mrf.mxu3 }
 0x1e1   : > { %v491_v23 = vadd.f32 %v448_v22, %v428_v0 }
 0x1e3   : > { %v561_v15 = vadd.f32 %v519_v17, %v491_v23  ;;  %v558_v17 = vpop.f32.mrf.mxu0 }
 0x1e5   : > { %v667_v16 = vmul.f32 -1.442695, %v561_v15 }
 0x1e7   : > { %721 = vpow2.f32 %v667_v16  ;;  %v559_v16 = vadd.f32 %v558_v17, %v497_v21 }
 0x1e8   : > { %v538_v18 = vpop.f32.mrf.mxu3 }
 0x1e9   : > { %v539_v2 = vadd.f32 %v538_v18, %v496_v12  ;;  %v488_v18 = vpop.f32.mrf.mxu1 }
 0x1eb   : > { %v581_v9 = vadd.f32 %v539_v2, %v492_v20 }
 0x1ed   : > { %v722_v10 = vpop.eup %721  ;;  %v668_v11 = vmul.f32 -1.442695, %v581_v9 }
 0x1ee   : > { %v565_v3 = vadd.f32 1.0, %v722_v10 }
 0x1ef   : > { %723 = vpow2.f32 %v668_v11  ;;  %v493_v11 = vadd.f32 %v488_v18, %v430_v13  ;;  %v608_v13 = vstv %s1070_s14 }
 0x1f0   : > { %725 = vrcp.f32 %v565_v3  ;;  %v577_v22 = vand.u32 2147483648, %v565_v3  ;;  %v575_v15 = vand.u32 2147483647, %v565_v3  ;;  %vm571_vm9 = vweird.f32 %v565_v3 }
 0x1f2   : > { %v578_v20 = vor.u32 1.1754944e-38, %v577_v22  ;;  %vm576_vm11 = vcmp.eq.f32.partialorder %v575_v15, 8.507059e+37 }
 0x1f5   : > { %v724_v14 = vpop.eup %723 }
 0x1f6   : > { %v726_v6 = vpop.eup %725  ;;  %v585_v19 = vadd.f32 1.0, %v724_v14 }
 0x1f7   : > { %v567_v8 = vmul.f32 %v726_v6, %v565_v3  ;;  %vm572_vm8 = vweird.f32 %v726_v6 }
 0x1f8   : > { %727 = vrcp.f32 %v585_v19  ;;  %vm573_vm10 = vmor %vm571_vm9, %vm572_vm8  ;;  %v597_v5 = vand.u32 2147483648, %v585_v19  ;;  %v595_v21 = vand.u32 2147483647, %v585_v19  ;;  %vm591_vm13 = vweird.f32 %v585_v19 }
 0x1f9   : > { %v568_v0 = vsub.f32 1.0, %v567_v8 }
 0x1fa   : > { %v598_v22 = vor.u32 1.1754944e-38, %v597_v5  ;;  %vm596_vm15 = vcmp.eq.f32.partialorder %v595_v21, 8.507059e+37 }
 0x1fb   : > { %v569_v23 = vmul.f32 %v726_v6, %v568_v0 }
 0x1fd   : > { %v570_v12 = vadd.f32 %v726_v6, %v569_v23 }
 0x1fe   : > { %v728_v1 = vpop.eup %727 }
 0x1ff   : > { %v587_v2 = vmul.f32 %v728_v1, %v585_v19  ;;  %v574_v9 = vsel %vm573_vm10, %v726_v6, %v570_v12  ;;  %vm592_vm12 = vweird.f32 %v728_v1 }
 0x200   : > { %v579_v10 = vsel %vm576_vm11, %v578_v20, %v574_v9  ;;  %vm593_vm14 = vmor %vm591_vm13, %vm592_vm12  ;;  %v610_v20 = vstv %s1062_s13 }
 0x201   : > { %v588_v14 = vsub.f32 1.0, %v587_v2  ;;  %v601_v8 = vmul.f32 %v579_v10, %v559_v16  ;;  %v609_v2 = vmul.f32 %v937_v7, %v608_v13 }
 0x203   : > { %v589_v0 = vmul.f32 %v728_v1, %v588_v14  ;;  %v602_v17 = vadd.f32 %v601_v8, %v493_v11 }
 0x205   : > { %v590_v3 = vadd.f32 %v728_v1, %v589_v0  ;;  %729 = vtanh.f32 %v602_v17 }
 0x207   : > { %v594_v23 = vsel %vm593_vm14, %v728_v1, %v590_v3 }
 0x208   : > { %v599_v6 = vsel %vm596_vm15, %v598_v22, %v594_v23 }
 0x209   : > { %v604_v15 = vsub.f32 1.0, %v599_v6  ;;  %v606_v18 = vmul.f32 %v937_v7, %v599_v6 }
 0x20b   : > { %v730_v12 = vpop.eup %729 }
 0x20c   : > { %v605_v16 = vmul.f32 %v730_v12, %v604_v15 }
 0x20e   : > { %v607_v9 = vadd.f32 %v606_v18, %v605_v16 }
 0x210   : > { %v611_v10 = vmul.f32 %v610_v20, %v607_v9  ;;  %297 = sbr.rel (!%p295_p0) target bundleno = 141 (0x8d), region = 94 }
 0x212   : > { %v612_v7 = vadd.f32 %v611_v10, %v609_v2  }
 0x214   : > { %617 = vst [vmem:[%s1525_s19 + $0x8] sm:$0xff] %v612_v7 }
 0x215   :  { %632 = dma.vmem_to_hbm [thread:$0]  %s625_s24, 2048, %s627_s23, [#allocation6], %s957_s25, %s957_s25, %s958_s26  }
 0x216   :  { %933 = dma.done.wait [#allocation6], 2048  }
 0x217   :  { %934 = vsyncadd [#allocation6], 4294965248 }
 0x218   :  { %637 = vsyncpa [#allocation5], 1 }
 0x219   :  { %638 = vsyncpa [#allocation9], 1 }
 0x21a   :  { %639 = vsyncpa [#allocation12], 1 }
 0x21b   :  { %640 = vsyncpa [#allocation15], 1 }
 0x21c   :  { %641 = vsyncpa [#allocation6], 1 }
 0x21d   :  { %642 = vsyncpa [#allocation7], 1 }

</bundles_post_ra>
